<compile_context>
chip_gen: v7x
topology: tpu7x:2x2x1
jax: 0.10.0
libtpu: 0.0.40
codegen_flags: <defaults>
</compile_context>

<pallas_src>
import jax
import jax.numpy as jnp
from jax import lax
from jax.experimental import pallas as pl
from jax.experimental.pallas import tpu as pltpu

EPS = 1e-5


def _pick_tile_rows(H, W):
    """Rows per spatial tile: several grid steps (pipelining / megacore) and a
    lane-dense output tile (TH*W a multiple of 128 where possible)."""
    for th in (8, 16, 4, 32, 2, 64):
        if th < H and H % th == 0 and th * W >= 128:
            return th
    return H


def _bn_relu_conv_kernel(x_ref, scale_ref, shift_ref, w_ref, out_ref,
                         arow_ref, pcol_ref):
    # x_ref:     (H, W, C)      f32  full image (resident across the h axis)
    # scale_ref: (1, C)         f32  folded BN scale   (gamma / sqrt(var+eps))
    # shift_ref: (1, C)         f32  folded BN shift   (beta - mean*scale)
    # w_ref:     (G, 9*C)       bf16 conv weight, columns ordered (kh, kw, c)
    # out_ref:   (G, TH*W)      f32  conv output tile, channel-major (lane dense)
    # arow_ref:  (TH+2, W, C)   f32  scratch: haloed BN+ReLU activation rows
    # pcol_ref:  (TH, W, 9*C)   f32  scratch: im2col patches
    H, W, C = x_ref.shape
    G, THW = out_ref.shape
    TH = THW // W

    h = pl.program_id(1)
    row0 = pl.multiple_of(h * TH, TH)

    scale = scale_ref[0]                     # (C,)
    shift = shift_ref[0]                     # (C,)

    def bn_relu(v):                          # f32 VPU math (v5e-safe)
        return jnp.maximum(v * scale + shift, 0.0)

    # --- haloed activation rows: arow[r] == relu(bn(x[row0 - 1 + r])); rows that
    #     fall outside the image are zero (conv 'SAME' zero padding applies AFTER
    #     bn/relu, so padding must be zero in the activation domain).
    top_i = jnp.maximum(row0 - 1, 0)
    bot_i = jnp.minimum(row0 + TH, H - 1)
    top_mask = (row0 > 0).astype(jnp.float32)
    bot_mask = (row0 + TH < H).astype(jnp.float32)

    arow_ref[0:1, :, :] = bn_relu(x_ref[pl.ds(top_i, 1)]) * top_mask
    arow_ref[1:TH + 1, :, :] = bn_relu(x_ref[pl.ds(row0, TH)])
    arow_ref[TH + 1:TH + 2, :, :] = bn_relu(x_ref[pl.ds(bot_i, 1)]) * bot_mask

    # --- im2col: materialize (TH, W, 9*C).  Horizontal (kw) zero padding is
    #     handled by writing shifted slices; only the 1-wide border columns are
    #     written with zeros (no full-tile zero fill).
    zcol = jnp.zeros((TH, 1, C), jnp.float32)
    for kh in range(3):
        src = arow_ref[kh:kh + TH, :, :]          # (TH, W, C), leading-dim offset only
        for kw in range(3):
            c0 = (kh * 3 + kw) * C
            c1 = c0 + C
            if kw == 0:                           # needs column j-1
                pcol_ref[:, 1:W, c0:c1] = src[:, 0:W - 1, :]
                pcol_ref[:, 0:1, c0:c1] = zcol
            elif kw == 1:                         # column j
                pcol_ref[:, :, c0:c1] = src
            else:                                 # needs column j+1
                pcol_ref[:, 0:W - 1, c0:c1] = src[:, 1:W, :]
                pcol_ref[:, W - 1:W, c0:c1] = zcol

    # --- one fat MXU contraction (K = 9*C):  (G, 9C) x (TH*W, 9C)^T -> (G, TH*W),
    #     f32 accumulation.  The result is already channel-major so the store is a
    #     single dense, lane-aligned write.
    patches = pcol_ref[...].reshape(TH * W, 9 * C).astype(w_ref.dtype)
    conv_t = lax.dot_general(
        w_ref[...], patches,
        dimension_numbers=(((1,), (1,)), ((), ())),
        preferred_element_type=jnp.float32)
    out_ref[...] = conv_t.astype(out_ref.dtype)


def single_layer_forward(x_nchw, gamma, beta, weight_oihw, *, eps=EPS,
                         conv_dtype=jnp.bfloat16):
    """forward(x) = concat([x, conv3x3(relu(bn(x)))], channel), NCHW in / NCHW out.

    BatchNorm uses batch statistics (the PyTorch module's training-mode default
    right after construction).  conv_dtype is the MXU operand dtype (bf16 default,
    f32 accumulation); pass jnp.float32 for a bit-accurate path.
    """
    N, C, H, W = x_nchw.shape
    G = weight_oihw.shape[0]
    x_nchw = x_nchw.astype(jnp.float32)

    # --- BN batch statistics + folded scale/shift (plain XLA reduction).
    mean = jnp.mean(x_nchw, axis=(0, 2, 3))
    var = jnp.var(x_nchw, axis=(0, 2, 3))                       # biased, like BN
    scale = (gamma.astype(jnp.float32) / jnp.sqrt(var + eps))
    shift = (beta.astype(jnp.float32) - mean * scale)
    scale = scale.reshape(1, C)
    shift = shift.reshape(1, C)

    # NHWC input for the kernel (channels on the lane axis).
    x_nhwc = jnp.transpose(x_nchw, (0, 2, 3, 1))

    # conv weight as (G, 9*C), columns ordered (kh, kw, c) to match the im2col.
    w_gk = jnp.transpose(weight_oihw, (0, 2, 3, 1)).reshape(G, 9 * C)
    w_gk = w_gk.astype(conv_dtype)

    TH = _pick_tile_rows(H, W)
    num_h = H // TH

    conv_flat = pl.pallas_call(
        _bn_relu_conv_kernel,
        out_shape=jax.ShapeDtypeStruct((N, G, H * W), jnp.float32),
        grid_spec=pltpu.PrefetchScalarGridSpec(
            num_scalar_prefetch=0,
            grid=(N, num_h),
            in_specs=[
                # full image per batch element; block index depends only on n so
                # the tile is DMA'd once and reused across all h steps.
                pl.BlockSpec((None, H, W, C), lambda n, h: (n, 0, 0, 0)),
                pl.BlockSpec((1, C), lambda n, h: (0, 0)),
                pl.BlockSpec((1, C), lambda n, h: (0, 0)),
                pl.BlockSpec((G, 9 * C), lambda n, h: (0, 0)),
            ],
            out_specs=pl.BlockSpec((None, G, TH * W), lambda n, h: (n, 0, h)),
            scratch_shapes=[
                pltpu.VMEM((TH + 2, W, C), jnp.float32),     # haloed activation rows
                pltpu.VMEM((TH, W, 9 * C), jnp.float32),     # im2col patches
            ],
        ),
        compiler_params=pltpu.CompilerParams(
            dimension_semantics=("parallel", "parallel"),
            vmem_limit_bytes=32 * 1024 * 1024,
        ),
    )(x_nhwc, scale, shift, w_gk)                  # (N, G, H*W), channel-major

    # Channel concat + reshape back to NCHW.  The conv result is already
    # channel-major with flat spatial, so there is no output transpose at all.
    out = jnp.concatenate([x_nchw.reshape(N, C, H * W), conv_flat], axis=1)
    return out.reshape(N, C + G, H, W)


# ---------------------------------------------------------------------------
# Pure-JAX reference (training-mode BN -> ReLU -> conv3x3 SAME -> concat)
# ---------------------------------------------------------------------------
def _reference(x_nchw, gamma, beta, weight_oihw, eps=EPS):
    mean = jnp.mean(x_nchw, axis=(0, 2, 3))
    var = jnp.var(x_nchw, axis=(0, 2, 3))           # biased
    xn = (x_nchw - mean[None, :, None, None]) / jnp.sqrt(var[None, :, None, None] + eps)
    xn = xn * gamma[None, :, None, None] + beta[None, :, None, None]
    a = jnp.maximum(xn, 0.0)
    conv = lax.conv_general_dilated(
        a, weight_oihw, window_strides=(1, 1), padding="SAME",
        dimension_numbers=("NCHW", "OIHW", "NCHW"))
    return jnp.concatenate([x_nchw, conv], axis=1)


if __name__ == "__main__":
    n_channels, growth_rate = 4, 8
    N, H, W = 2, 16, 16

    key = jax.random.PRNGKey(0)
    kx, kg, kb, kw = jax.random.split(key, 4)

    x = jax.random.normal(kx, (N, n_channels, H, W), dtype=jnp.float32)
    gamma = jax.random.uniform(kg, (n_channels,), dtype=jnp.float32,
                               minval=0.5, maxval=1.5)
    beta = 0.1 * jax.random.normal(kb, (n_channels,), dtype=jnp.float32)
    # deterministic stand-in for PyTorch's kaiming init of conv1.weight (G, C, 3, 3)
    weight = jax.random.normal(kw, (growth_rate, n_channels, 3, 3),
                               dtype=jnp.float32) * (2.0 / (9 * n_channels)) ** 0.5

    ref = _reference(x, gamma, beta, weight)

    # f32 MXU-operand path: tight numerical check of the kernel structure.
    out_f32 = jax.block_until_ready(
        single_layer_forward(x, gamma, beta, weight, conv_dtype=jnp.float32))
    assert out_f32.shape == (N, n_channels + growth_rate, H, W), out_f32.shape
    assert jnp.allclose(out_f32, ref, rtol=1e-4, atol=1e-4), \
        float(jnp.max(jnp.abs(out_f32 - ref)))

    # default bf16 MXU-operand path (f32 accumulation): tolerance reflects the
    # ~2^-9 relative rounding of the bf16 conv inputs, not the accumulation.
    out_bf16 = jax.block_until_ready(single_layer_forward(x, gamma, beta, weight))
    assert out_bf16.shape == (N, n_channels + growth_rate, H, W), out_bf16.shape
    assert jnp.allclose(out_bf16, ref, rtol=5e-2, atol=5e-2), \
        float(jnp.max(jnp.abs(out_bf16 - ref)))

    print("KERNEL_OK")
</pallas_src>

<mosaic_0001>
module attributes {stable_mosaic.version = 11 : i64} {
  func.func @_bn_relu_conv_kernel(%arg0: i32, %arg1: i32, %arg2: memref<1x16x16x4xf32, #tpu.memory_space<vmem>>, %arg3: memref<1x4xf32, #tpu.memory_space<vmem>>, %arg4: memref<1x4xf32, #tpu.memory_space<vmem>>, %arg5: memref<8x36xf32, #tpu.memory_space<vmem>>, %arg6: memref<1x8x128xf32, #tpu.memory_space<vmem>>, %arg7: memref<10x16x4xf32, #tpu.memory_space<vmem>>, %arg8: memref<8x16x36xf32, #tpu.memory_space<vmem>>) attributes {dimension_semantics = [#tpu.dimension_semantics<parallel>, #tpu.dimension_semantics<parallel>], iteration_bounds = array<i64: 2, 2>, scalar_prefetch = 0 : i64, scratch_operands = 2 : i64, tpu.core_type = #tpu.core_type<tc>, window_params = [{transform_indices = @transform_0, window_bounds = array<i64: 1, 16, 16, 4>}, {pipeline_mode = #tpu.pipeline_mode<synchronous>, transform_indices = @transform_1, window_bounds = array<i64: 1, 4>}, {pipeline_mode = #tpu.pipeline_mode<synchronous>, transform_indices = @transform_2, window_bounds = array<i64: 1, 4>}, {pipeline_mode = #tpu.pipeline_mode<synchronous>, transform_indices = @transform_3, window_bounds = array<i64: 8, 36>}, {transform_indices = @transform_4, window_bounds = array<i64: 1, 8, 128>}]} {
    %c8_i32 = arith.constant 8 : i32
    %0 = arith.muli %arg1, %c8_i32 : i32
    %1 = tpu.assume_multiple %0, 8 : i32
    %c0 = arith.constant 0 : index
    %c0_0 = arith.constant 0 : index
    %2 = vector.load %arg3[%c0, %c0_0] : memref<1x4xf32, #tpu.memory_space<vmem>>, vector<1x4xf32>
    %3 = vector.shape_cast %2 : vector<1x4xf32> to vector<4xf32>
    %c0_1 = arith.constant 0 : index
    %c0_2 = arith.constant 0 : index
    %4 = vector.load %arg4[%c0_1, %c0_2] : memref<1x4xf32, #tpu.memory_space<vmem>>, vector<1x4xf32>
    %5 = vector.shape_cast %4 : vector<1x4xf32> to vector<4xf32>
    %c1_i32 = arith.constant 1 : i32
    %6 = arith.subi %1, %c1_i32 : i32
    %c0_i32 = arith.constant 0 : i32
    %7 = arith.maxsi %6, %c0_i32 : i32
    %c8_i32_3 = arith.constant 8 : i32
    %8 = arith.addi %1, %c8_i32_3 : i32
    %c15_i32 = arith.constant 15 : i32
    %9 = arith.minsi %8, %c15_i32 : i32
    %c0_i32_4 = arith.constant 0 : i32
    %10 = arith.cmpi sgt, %1, %c0_i32_4 : i32
    %11 = arith.extui %10 : i1 to i32
    %12 = arith.sitofp %11 : i32 to f32
    %c8_i32_5 = arith.constant 8 : i32
    %13 = arith.addi %1, %c8_i32_5 : i32
    %c16_i32 = arith.constant 16 : i32
    %14 = arith.cmpi slt, %13, %c16_i32 : i32
    %15 = arith.extui %14 : i1 to i32
    %16 = arith.sitofp %15 : i32 to f32
    %c0_6 = arith.constant 0 : index
    %17 = arith.index_cast %7 : i32 to index
    %c0_7 = arith.constant 0 : index
    %c0_8 = arith.constant 0 : index
    %18 = vector.load %arg2[%c0_6, %17, %c0_7, %c0_8] : memref<1x16x16x4xf32, #tpu.memory_space<vmem>>, vector<1x1x16x4xf32>
    %19 = vector.shape_cast %18 : vector<1x1x16x4xf32> to vector<1x16x4xf32>
    %20 = vector.shape_cast %3 : vector<4xf32> to vector<1x1x4xf32>
    %21 = vector.broadcast %20 : vector<1x1x4xf32> to vector<1x16x4xf32>
    %22 = arith.mulf %19, %21 : vector<1x16x4xf32>
    %23 = vector.shape_cast %5 : vector<4xf32> to vector<1x1x4xf32>
    %24 = vector.broadcast %23 : vector<1x1x4xf32> to vector<1x16x4xf32>
    %25 = arith.addf %22, %24 : vector<1x16x4xf32>
    %cst = arith.constant 0.000000e+00 : f32
    %26 = vector.broadcast %cst : f32 to vector<1x16x4xf32>
    %27 = arith.maximumf %25, %26 : vector<1x16x4xf32>
    %28 = vector.broadcast %12 : f32 to vector<1x16x4xf32>
    %29 = arith.mulf %27, %28 : vector<1x16x4xf32>
    %c0_9 = arith.constant 0 : index
    %c0_10 = arith.constant 0 : index
    %c0_11 = arith.constant 0 : index
    %30 = vector.load %arg7[%c0_9, %c0_10, %c0_11] : memref<10x16x4xf32, #tpu.memory_space<vmem>>, vector<1x16x4xf32>
    tpu.vector_store %arg7[%c0_9, %c0_10, %c0_11], %29 {strides = array<i32>} : memref<10x16x4xf32, #tpu.memory_space<vmem>>, vector<1x16x4xf32>,
    %c0_12 = arith.constant 0 : index
    %31 = arith.index_cast %1 : i32 to index
    %c0_13 = arith.constant 0 : index
    %c0_14 = arith.constant 0 : index
    %32 = vector.load %arg2[%c0_12, %31, %c0_13, %c0_14] : memref<1x16x16x4xf32, #tpu.memory_space<vmem>>, vector<1x8x16x4xf32>
    %33 = vector.shape_cast %32 : vector<1x8x16x4xf32> to vector<8x16x4xf32>
    %34 = vector.shape_cast %3 : vector<4xf32> to vector<1x1x4xf32>
    %35 = vector.broadcast %34 : vector<1x1x4xf32> to vector<8x16x4xf32>
    %36 = arith.mulf %33, %35 : vector<8x16x4xf32>
    %37 = vector.shape_cast %5 : vector<4xf32> to vector<1x1x4xf32>
    %38 = vector.broadcast %37 : vector<1x1x4xf32> to vector<8x16x4xf32>
    %39 = arith.addf %36, %38 : vector<8x16x4xf32>
    %cst_15 = arith.constant 0.000000e+00 : f32
    %40 = vector.broadcast %cst_15 : f32 to vector<8x16x4xf32>
    %41 = arith.maximumf %39, %40 : vector<8x16x4xf32>
    %c1 = arith.constant 1 : index
    %c0_16 = arith.constant 0 : index
    %c0_17 = arith.constant 0 : index
    %42 = vector.load %arg7[%c1, %c0_16, %c0_17] : memref<10x16x4xf32, #tpu.memory_space<vmem>>, vector<8x16x4xf32>
    tpu.vector_store %arg7[%c1, %c0_16, %c0_17], %41 {strides = array<i32>} : memref<10x16x4xf32, #tpu.memory_space<vmem>>, vector<8x16x4xf32>,
    %c0_18 = arith.constant 0 : index
    %43 = arith.index_cast %9 : i32 to index
    %c0_19 = arith.constant 0 : index
    %c0_20 = arith.constant 0 : index
    %44 = vector.load %arg2[%c0_18, %43, %c0_19, %c0_20] : memref<1x16x16x4xf32, #tpu.memory_space<vmem>>, vector<1x1x16x4xf32>
    %45 = vector.shape_cast %44 : vector<1x1x16x4xf32> to vector<1x16x4xf32>
    %46 = vector.shape_cast %3 : vector<4xf32> to vector<1x1x4xf32>
    %47 = vector.broadcast %46 : vector<1x1x4xf32> to vector<1x16x4xf32>
    %48 = arith.mulf %45, %47 : vector<1x16x4xf32>
    %49 = vector.shape_cast %5 : vector<4xf32> to vector<1x1x4xf32>
    %50 = vector.broadcast %49 : vector<1x1x4xf32> to vector<1x16x4xf32>
    %51 = arith.addf %48, %50 : vector<1x16x4xf32>
    %cst_21 = arith.constant 0.000000e+00 : f32
    %52 = vector.broadcast %cst_21 : f32 to vector<1x16x4xf32>
    %53 = arith.maximumf %51, %52 : vector<1x16x4xf32>
    %54 = vector.broadcast %16 : f32 to vector<1x16x4xf32>
    %55 = arith.mulf %53, %54 : vector<1x16x4xf32>
    %c9 = arith.constant 9 : index
    %c0_22 = arith.constant 0 : index
    %c0_23 = arith.constant 0 : index
    %56 = vector.load %arg7[%c9, %c0_22, %c0_23] : memref<10x16x4xf32, #tpu.memory_space<vmem>>, vector<1x16x4xf32>
    tpu.vector_store %arg7[%c9, %c0_22, %c0_23], %55 {strides = array<i32>} : memref<10x16x4xf32, #tpu.memory_space<vmem>>, vector<1x16x4xf32>,
    %cst_24 = arith.constant 0.000000e+00 : f32
    %57 = vector.broadcast %cst_24 : f32 to vector<8x1x4xf32>
    %c0_25 = arith.constant 0 : index
    %c0_26 = arith.constant 0 : index
    %c0_27 = arith.constant 0 : index
    %58 = vector.load %arg7[%c0_25, %c0_26, %c0_27] : memref<10x16x4xf32, #tpu.memory_space<vmem>>, vector<8x16x4xf32>
    %59 = vector.extract_strided_slice %58 {offsets = [0, 0, 0], sizes = [8, 15, 4], strides = [1, 1, 1]} : vector<8x16x4xf32> to vector<8x15x4xf32>
    %c0_28 = arith.constant 0 : index
    %c1_29 = arith.constant 1 : index
    %c0_30 = arith.constant 0 : index
    %60 = vector.load %arg8[%c0_28, %c1_29, %c0_30] : memref<8x16x36xf32, #tpu.memory_space<vmem>>, vector<8x15x4xf32>
    tpu.vector_store %arg8[%c0_28, %c1_29, %c0_30], %59 {strides = array<i32>} : memref<8x16x36xf32, #tpu.memory_space<vmem>>, vector<8x15x4xf32>,
    %c0_31 = arith.constant 0 : index
    %c0_32 = arith.constant 0 : index
    %c0_33 = arith.constant 0 : index
    %61 = vector.load %arg8[%c0_31, %c0_32, %c0_33] : memref<8x16x36xf32, #tpu.memory_space<vmem>>, vector<8x1x4xf32>
    tpu.vector_store %arg8[%c0_31, %c0_32, %c0_33], %57 {strides = array<i32>} : memref<8x16x36xf32, #tpu.memory_space<vmem>>, vector<8x1x4xf32>,
    %c0_34 = arith.constant 0 : index
    %c0_35 = arith.constant 0 : index
    %c4 = arith.constant 4 : index
    %62 = vector.load %arg8[%c0_34, %c0_35, %c4] : memref<8x16x36xf32, #tpu.memory_space<vmem>>, vector<8x16x4xf32>
    tpu.vector_store %arg8[%c0_34, %c0_35, %c4], %58 {strides = array<i32>} : memref<8x16x36xf32, #tpu.memory_space<vmem>>, vector<8x16x4xf32>,
    %63 = vector.extract_strided_slice %58 {offsets = [0, 1, 0], sizes = [8, 15, 4], strides = [1, 1, 1]} : vector<8x16x4xf32> to vector<8x15x4xf32>
    %c0_36 = arith.constant 0 : index
    %c0_37 = arith.constant 0 : index
    %c8 = arith.constant 8 : index
    %64 = vector.load %arg8[%c0_36, %c0_37, %c8] : memref<8x16x36xf32, #tpu.memory_space<vmem>>, vector<8x15x4xf32>
    tpu.vector_store %arg8[%c0_36, %c0_37, %c8], %63 {strides = array<i32>} : memref<8x16x36xf32, #tpu.memory_space<vmem>>, vector<8x15x4xf32>,
    %c0_38 = arith.constant 0 : index
    %c15 = arith.constant 15 : index
    %c8_39 = arith.constant 8 : index
    %65 = vector.load %arg8[%c0_38, %c15, %c8_39] : memref<8x16x36xf32, #tpu.memory_space<vmem>>, vector<8x1x4xf32>
    tpu.vector_store %arg8[%c0_38, %c15, %c8_39], %57 {strides = array<i32>} : memref<8x16x36xf32, #tpu.memory_space<vmem>>, vector<8x1x4xf32>,
    %c1_40 = arith.constant 1 : index
    %c0_41 = arith.constant 0 : index
    %c0_42 = arith.constant 0 : index
    %66 = vector.load %arg7[%c1_40, %c0_41, %c0_42] : memref<10x16x4xf32, #tpu.memory_space<vmem>>, vector<8x16x4xf32>
    %67 = vector.extract_strided_slice %66 {offsets = [0, 0, 0], sizes = [8, 15, 4], strides = [1, 1, 1]} : vector<8x16x4xf32> to vector<8x15x4xf32>
    %c0_43 = arith.constant 0 : index
    %c1_44 = arith.constant 1 : index
    %c12 = arith.constant 12 : index
    %68 = vector.load %arg8[%c0_43, %c1_44, %c12] : memref<8x16x36xf32, #tpu.memory_space<vmem>>, vector<8x15x4xf32>
    tpu.vector_store %arg8[%c0_43, %c1_44, %c12], %67 {strides = array<i32>} : memref<8x16x36xf32, #tpu.memory_space<vmem>>, vector<8x15x4xf32>,
    %c0_45 = arith.constant 0 : index
    %c0_46 = arith.constant 0 : index
    %c12_47 = arith.constant 12 : index
    %69 = vector.load %arg8[%c0_45, %c0_46, %c12_47] : memref<8x16x36xf32, #tpu.memory_space<vmem>>, vector<8x1x4xf32>
    tpu.vector_store %arg8[%c0_45, %c0_46, %c12_47], %57 {strides = array<i32>} : memref<8x16x36xf32, #tpu.memory_space<vmem>>, vector<8x1x4xf32>,
    %c0_48 = arith.constant 0 : index
    %c0_49 = arith.constant 0 : index
    %c16 = arith.constant 16 : index
    %70 = vector.load %arg8[%c0_48, %c0_49, %c16] : memref<8x16x36xf32, #tpu.memory_space<vmem>>, vector<8x16x4xf32>
    tpu.vector_store %arg8[%c0_48, %c0_49, %c16], %66 {strides = array<i32>} : memref<8x16x36xf32, #tpu.memory_space<vmem>>, vector<8x16x4xf32>,
    %71 = vector.extract_strided_slice %66 {offsets = [0, 1, 0], sizes = [8, 15, 4], strides = [1, 1, 1]} : vector<8x16x4xf32> to vector<8x15x4xf32>
    %c0_50 = arith.constant 0 : index
    %c0_51 = arith.constant 0 : index
    %c20 = arith.constant 20 : index
    %72 = vector.load %arg8[%c0_50, %c0_51, %c20] : memref<8x16x36xf32, #tpu.memory_space<vmem>>, vector<8x15x4xf32>
    tpu.vector_store %arg8[%c0_50, %c0_51, %c20], %71 {strides = array<i32>} : memref<8x16x36xf32, #tpu.memory_space<vmem>>, vector<8x15x4xf32>,
    %c0_52 = arith.constant 0 : index
    %c15_53 = arith.constant 15 : index
    %c20_54 = arith.constant 20 : index
    %73 = vector.load %arg8[%c0_52, %c15_53, %c20_54] : memref<8x16x36xf32, #tpu.memory_space<vmem>>, vector<8x1x4xf32>
    tpu.vector_store %arg8[%c0_52, %c15_53, %c20_54], %57 {strides = array<i32>} : memref<8x16x36xf32, #tpu.memory_space<vmem>>, vector<8x1x4xf32>,
    %c2 = arith.constant 2 : index
    %c0_55 = arith.constant 0 : index
    %c0_56 = arith.constant 0 : index
    %74 = vector.load %arg7[%c2, %c0_55, %c0_56] : memref<10x16x4xf32, #tpu.memory_space<vmem>>, vector<8x16x4xf32>
    %75 = vector.extract_strided_slice %74 {offsets = [0, 0, 0], sizes = [8, 15, 4], strides = [1, 1, 1]} : vector<8x16x4xf32> to vector<8x15x4xf32>
    %c0_57 = arith.constant 0 : index
    %c1_58 = arith.constant 1 : index
    %c24 = arith.constant 24 : index
    %76 = vector.load %arg8[%c0_57, %c1_58, %c24] : memref<8x16x36xf32, #tpu.memory_space<vmem>>, vector<8x15x4xf32>
    tpu.vector_store %arg8[%c0_57, %c1_58, %c24], %75 {strides = array<i32>} : memref<8x16x36xf32, #tpu.memory_space<vmem>>, vector<8x15x4xf32>,
    %c0_59 = arith.constant 0 : index
    %c0_60 = arith.constant 0 : index
    %c24_61 = arith.constant 24 : index
    %77 = vector.load %arg8[%c0_59, %c0_60, %c24_61] : memref<8x16x36xf32, #tpu.memory_space<vmem>>, vector<8x1x4xf32>
    tpu.vector_store %arg8[%c0_59, %c0_60, %c24_61], %57 {strides = array<i32>} : memref<8x16x36xf32, #tpu.memory_space<vmem>>, vector<8x1x4xf32>,
    %c0_62 = arith.constant 0 : index
    %c0_63 = arith.constant 0 : index
    %c28 = arith.constant 28 : index
    %78 = vector.load %arg8[%c0_62, %c0_63, %c28] : memref<8x16x36xf32, #tpu.memory_space<vmem>>, vector<8x16x4xf32>
    tpu.vector_store %arg8[%c0_62, %c0_63, %c28], %74 {strides = array<i32>} : memref<8x16x36xf32, #tpu.memory_space<vmem>>, vector<8x16x4xf32>,
    %79 = vector.extract_strided_slice %74 {offsets = [0, 1, 0], sizes = [8, 15, 4], strides = [1, 1, 1]} : vector<8x16x4xf32> to vector<8x15x4xf32>
    %c0_64 = arith.constant 0 : index
    %c0_65 = arith.constant 0 : index
    %c32 = arith.constant 32 : index
    %80 = vector.load %arg8[%c0_64, %c0_65, %c32] : memref<8x16x36xf32, #tpu.memory_space<vmem>>, vector<8x15x4xf32>
    tpu.vector_store %arg8[%c0_64, %c0_65, %c32], %79 {strides = array<i32>} : memref<8x16x36xf32, #tpu.memory_space<vmem>>, vector<8x15x4xf32>,
    %c0_66 = arith.constant 0 : index
    %c15_67 = arith.constant 15 : index
    %c32_68 = arith.constant 32 : index
    %81 = vector.load %arg8[%c0_66, %c15_67, %c32_68] : memref<8x16x36xf32, #tpu.memory_space<vmem>>, vector<8x1x4xf32>
    tpu.vector_store %arg8[%c0_66, %c15_67, %c32_68], %57 {strides = array<i32>} : memref<8x16x36xf32, #tpu.memory_space<vmem>>, vector<8x1x4xf32>,
    %c0_69 = arith.constant 0 : index
    %c0_70 = arith.constant 0 : index
    %c0_71 = arith.constant 0 : index
    %82 = vector.load %arg8[%c0_69, %c0_70, %c0_71] : memref<8x16x36xf32, #tpu.memory_space<vmem>>, vector<8x16x36xf32>
    %83 = vector.shape_cast %82 : vector<8x16x36xf32> to vector<128x36xf32>
    %c0_72 = arith.constant 0 : index
    %c0_73 = arith.constant 0 : index
    %84 = vector.load %arg5[%c0_72, %c0_73] : memref<8x36xf32, #tpu.memory_space<vmem>>, vector<8x36xf32>
    %cst_74 = arith.constant dense<0.000000e+00> : vector<8x128xf32>
    %85 = tpu.matmul %84, %83, %cst_74 {dimension_numbers = #tpu.dot_dimension_numbers<[1], [1], [0], [0], [0, 0, 1, 0], [], []>} : vector<8x36xf32>, vector<128x36xf32>, vector<8x128xf32> -> vector<8x128xf32>
    %c0_75 = arith.constant 0 : index
    %c0_76 = arith.constant 0 : index
    %c0_77 = arith.constant 0 : index
    %86 = vector.load %arg6[%c0_75, %c0_76, %c0_77] : memref<1x8x128xf32, #tpu.memory_space<vmem>>, vector<1x8x128xf32>
    %87 = vector.shape_cast %86 : vector<1x8x128xf32> to vector<8x128xf32>
    %88 = vector.shape_cast %85 : vector<8x128xf32> to vector<1x8x128xf32>
    tpu.vector_store %arg6[%c0_75, %c0_76, %c0_77], %88 {strides = array<i32>} : memref<1x8x128xf32, #tpu.memory_space<vmem>>, vector<1x8x128xf32>,
    return
  }
  func.func @transform_0(%arg0: i32, %arg1: i32) -> (i32, i32, i32, i32) {
    %c0_i32 = arith.constant 0 : i32
    %c0_i32_0 = arith.constant 0 : i32
    %c0_i32_1 = arith.constant 0 : i32
    %c0_i32_2 = arith.constant 0 : i32
    return %arg0, %c0_i32, %c0_i32_0, %c0_i32_1 : i32, i32, i32, i32
  }
  func.func @transform_1(%arg0: i32, %arg1: i32) -> (i32, i32) {
    %c0_i32 = arith.constant 0 : i32
    %c0_i32_0 = arith.constant 0 : i32
    %c0_i32_1 = arith.constant 0 : i32
    return %c0_i32, %c0_i32_0 : i32, i32
  }
  func.func @transform_2(%arg0: i32, %arg1: i32) -> (i32, i32) {
    %c0_i32 = arith.constant 0 : i32
    %c0_i32_0 = arith.constant 0 : i32
    %c0_i32_1 = arith.constant 0 : i32
    return %c0_i32, %c0_i32_0 : i32, i32
  }
  func.func @transform_3(%arg0: i32, %arg1: i32) -> (i32, i32) {
    %c0_i32 = arith.constant 0 : i32
    %c0_i32_0 = arith.constant 0 : i32
    %c0_i32_1 = arith.constant 0 : i32
    return %c0_i32, %c0_i32_0 : i32, i32
  }
  func.func @transform_4(%arg0: i32, %arg1: i32) -> (i32, i32, i32) {
    %c0_i32 = arith.constant 0 : i32
    %c0_i32_0 = arith.constant 0 : i32
    return %arg0, %c0_i32, %arg1 : i32, i32, i32
  }
}

</mosaic_0001>

<bundles_post_ra>
// kernel: tpu_custom_call.1
= control target key start
LH: loop header
LB: loop body
LE: loop exit
PB: predicated region body
PF: predicated region fallthrough
CT: control target
= control target key end

     0   :  { %9 = vsyncpa [#allocation5], 0  ;;  %s2398_s0 = inlined_call_operand.vmem [shape: f32[2,16,16,4], index: 0, kind: input, shape index: {}]   ;;  %s2399_s1 = inlined_call_operand.vmem [shape: f32[1,4], index: 1, kind: input, shape index: {}]   ;;  %s2400_s2 = inlined_call_operand.vmem [shape: f32[1,4], index: 2, kind: input, shape index: {}]   ;;  %s2401_s3 = inlined_call_operand.vmem [shape: f32[8,36], index: 3, kind: input, shape index: {}]   ;;  %s2402_s4 = inlined_call_operand.hbm [shape: f32[2,8,256], index: 4, kind: output, shape index: {}]  }
   0x1   :  { %11 = vsyncpa [#allocation5 + $0x1], 0  ;;  %s1617_s15 = smov 0   ;;  %s1619_s16 = smov 0  }
   0x2   :  { %s1621_s17 = smov 0   ;;  %s1623_s18 = smov 0  }
   0x3   :  { %s1625_s19 = smov 0   ;;  %s1627_s20 = smov 0  }
   0x4   :  { %s1629_s21 = smov 0   ;;  %s1631_s22 = smov 0  }
   0x5 LB: > { %s1279_s23 = sadd.s32 4294967295, %s1578_s22   ;;  %s1280_s24 = sadd.s32 4294967294, %s1578_s22   ;;  %s1578_s22 = sphi %s1631_s22, %s17_s22   ;;  %s1574_s21 = sphi %s1629_s21, %s2465_s21   ;;  %s1570_s20 = sphi %s1627_s20, %s2464_s20   ;;  %s1566_s19 = sphi %s1625_s19, %s2463_s19   ;;  %s1562_s18 = sphi %s1623_s18, %s2462_s18   ;;  %s1558_s17 = sphi %s1621_s17, %s2461_s17   ;;  %s1554_s16 = sphi %s1619_s16, %s2460_s16   ;;  %s1550_s15 = sphi %s1617_s15, %s2459_s15  }
   0x6   : > { %s26_s25 = sadd.s32 1, %s1570_s20  ;;  %s29_s26 = sadd.s32 1, %s1574_s21 }
   0x7   : > { %p27_p0 = scmp.ge.s32.totalorder %s26_s25, 2  ;;  %p137_p1 = scmp.ne.s32.totalorder %s1558_s17, %s1554_s16 }
   0x8   : > { %p138_p2 = scmp.eq.s32.totalorder %s1279_s23, 3  ;;  %p143_p5 = scmp.ne.s32.totalorder %s1554_s16, %s1550_s15 }
   0x9   : > { %s2467_s25 = smov (%p27_p0, %s26_s25), 0  ;;  %s2469_s26 = smov (!%p27_p0, %s29_s26), %s1574_s21 }
   0xa   : > { %s123_s27 = ssub.s32 %s1570_s20, %s2467_s25  ;;  %p1668_p3 = por %p138_p2, %p137_p1 }
   0xb   : > { %p31_p4 = scmp.ge.s32.totalorder %s2469_s26, 2  ;;  %p144_p6 = scmp.eq.s32.totalorder %s1280_s24, 3 }
   0xc   : > { %p1283_p7 = scmp.ge.s32.totalorder %s1578_s22, 1  ;;  %p179_p9 = scmp.lt.s32.totalorder %s1578_s22, 5 }
   0xd   : > { %s2471_s26 = smov (%p31_p4, %s2469_s26), 0  ;;  %p1677_p8 = por %p144_p6, %p143_p5 }
   0xe   : > { %s122_s30 = ssub.s32 %s1574_s21, %s2471_s26  ;;  %s127_s5 = sadd.s32 1, %s1558_s17 }
   0xf   : > { %s124_s6 = sor.u32 %s123_s27, %s122_s30  ;;  %p180_p10 = pnand %p1283_p7, %p179_p9 }
  0x10   : > { %p125_p11 = scmp.eq.s32.totalorder %s124_s6, 0  ;;  %p205_p12 = scmp.lt.s32.totalorder (!%p180_p10), %s1566_s19, 1  ;;  %v1699_v0 = vld [vmem:[%s2399_s1] ss:$0 sm:$0xff] (!%p180_p10)  ;;  %vm250_vm0 = vcmask (!%p180_p10), 31744   ;;  %vm369_vm1 = vcmask (!%p180_p10), 30720  }
  0x11   : > { %183 = sbr.rel (%p180_p10) target bundleno = 655 (0x28f), region = 36  ;;  %s1317_s9 = sshll.u32 (!%p180_p10), %s1562_s18, 7  ;;  %v1704_v1 = vld [vmem:[%s2400_s2] ss:$0 sm:$0xff] (!%p180_p10)  ;;  %vm385_vm2 = vcmask (!%p180_p10), 24576   ;;  %vm458_vm3 = vcmask (!%p180_p10), 64544  }
  0x12   : > { %s1686_s7 = scalar_select %p125_p11, %s1558_s17, %s127_s5  }
  0x13   : > { %s1710_s5 = sshll.u32 (!%p180_p10), %s1562_s18, 3  ;;  %s1580_s12 = smov (!%p180_p10), 12   ;;  %vm523_vm4 = vcmask (!%p180_p10), 97345   ;;  %vm2405_vm5 = vcmask (!%p180_p10), 122976   ;;  %vm2409_vm6 = vcmask (!%p180_p10), 97344   ;;  %vm2411_vm7 = vcmask (!%p180_p10), 90176  }
  0x14   : > { %s1288_s6 = sadd.s32 (!%p180_p10), 4294967295, %s1710_s5  ;;  %p219_p13 = scmp.gt.s32.totalorder (!%p180_p10), %s1710_s5, 0  ;;  %vm2406_vm8 = vcmask (!%p180_p10), 130144   ;;  %vm632_vm9 = vcmask (!%p180_p10), 129120   ;;  %vm705_vm10 = vcmask (!%p180_p10), 162944   ;;  %vm770_vm11 = vcmask (!%p180_p10), 195745  }
  0x15   : > { %p214_p0 = scmp.gt.s32.totalorder (!%p180_p10), %s1288_s6, 0  ;;  %s1581_s14 = smov (!%p180_p10), 16   ;;  %vm772_vm12 = vcmask (!%p180_p10), 195744   ;;  %vm788_vm13 = vcmask (!%p180_p10), 188576   ;;  %vm878_vm14 = vcmask (!%p180_p10), 228544   ;;  %vm880_vm15 = vcmask (!%p180_p10), 227520  }
  0x16   : > { %s1583_s23 = smov (!%p180_p10), 20   ;;  %s2403_s24 = smov (!%p180_p10), 24  }
  0x17   : > { %s1585_s27 = smov (!%p180_p10), 28  }
  0x18   : > { %s206_s8 = scalar_select %p205_p12, %s1566_s19, 1 }
  0x19   : > { %s2473_s6 = smov (!%p214_p0, %s1288_s6), 0 }
  0x1a   : > { %s1316_s10 = sshll.u32 %s206_s8, 8 }
  0x1b   : > { %s1694_s13 = scalar_lea.vmem %s2398_s0, %s1316_s10 }
  0x1c   : > { %s1707_s30 = scalar_lea.vmem %s1694_s13, %s1317_s9  ;;  %s1289_s9 = sshll.u32 %s2473_s6, 4 }
  0x1d   : > { %v256_v2 = vld [vmem:[%s1707_s30 + $0x8] sm:$0xff]  ;;  %v255_v3 = vld [vmem:[%s1707_s30] sm:$0xff]  ;;  %v258_v4 = vld [vmem:[%s1707_s30 + $0x18] sm:$0xff]  ;;  %s1724_s8 = scalar_select %p219_p13, 1, 0 }
  0x1e   : > { %v272_v5 = vmul.f32 %v1699_v0, %v256_v2  ;;  %v271_v6 = vmul.f32 %v1699_v0, %v255_v3  ;;  %v274_v7 = vmul.f32 %v1699_v0, %v258_v4  ;;  %v257_v8 = vld [vmem:[%s1707_s30 + $0x10] sm:$0xff]  ;;  %v260_v9 = vld [vmem:[%s1707_s30 + $0x28] sm:$0xff]  ;;  %v259_v10 = vld [vmem:[%s1707_s30 + $0x20] sm:$0xff]  ;;  %s226_s10 = scalar_lea.vmem %s1694_s13, %s1289_s9  ;;  %v1582_v2 = vmov 0.0   ;;  %s1586_s6 = smov 8  }
  0x1f   : > { %v273_v11 = vmul.f32 %v1699_v0, %v257_v8  ;;  %v276_v12 = vmul.f32 %v1699_v0, %v260_v9  ;;  %v275_v13 = vmul.f32 %v1699_v0, %v259_v10  ;;  %v262_v14 = vld [vmem:[%s1707_s30 + $0x38] sm:$0xff]  ;;  %v261_v15 = vld [vmem:[%s1707_s30 + $0x30] sm:$0xff]  ;;  %v264_v24 = vld [vmem:[%s1707_s30 + $0x48] sm:$0xff]  ;;  %s221_s11 = scvt.s32.f32 %s1724_s8  ;;  %386 = vst.msk [vmem:[#allocation3] sm:$0x1] %vm385_vm2, %v1582_v2  ;;  %s1587_s8 = smov 4  }
  0x20   : > { %v288_v16 = vadd.f32 %v1704_v1, %v272_v5  ;;  %v287_v17 = vadd.f32 %v1704_v1, %v271_v6  ;;  %v290_v18 = vadd.f32 %v1704_v1, %v274_v7  ;;  %v278_v19 = vmul.f32 %v1699_v0, %v262_v14  ;;  %v263_v25 = vld [vmem:[%s1707_s30 + $0x40] sm:$0xff]  ;;  %v228_v34 = vld [vmem:[%s226_s10 + $0x8] sm:$0xff]  ;;  %v266_v63 = vld [vmem:[%s1707_s30 + $0x58] sm:$0xff]  ;;  %387 = vst.msk [vmem:[#allocation3 + $0x10] sm:$0x1] %vm385_vm2, %v1582_v2  ;;  %s1589_s9 = smov 32  }
  0x21   : > { %v289_v20 = vadd.f32 %v1704_v1, %v273_v11  ;;  %v292_v21 = vadd.f32 %v1704_v1, %v276_v12  ;;  %v291_v22 = vadd.f32 %v1704_v1, %v275_v13  ;;  %v277_v23 = vmul.f32 %v1699_v0, %v261_v15  ;;  %v227_v33 = vld [vmem:[%s226_s10] sm:$0xff]  ;;  %388 = vst.msk [vmem:[#allocation3 + $0x20] sm:$0x1] %vm385_vm2, %v1582_v2  ;;  %v265_v4 = vld [vmem:[%s1707_s30 + $0x50] sm:$0xff]  ;;  %v268_v15 = vld [vmem:[%s1707_s30 + $0x68] sm:$0xff] }
  0x22   : > { %v304_v26 = vmax.f32 %v288_v16, 0.0  ;;  %v303_v27 = vmax.f32 %v287_v17, 0.0  ;;  %v306_v28 = vmax.f32 %v290_v18, 0.0  ;;  %v294_v29 = vadd.f32 %v1704_v1, %v278_v19  ;;  %389 = vst.msk [vmem:[#allocation3 + $0x30] sm:$0x1] %vm385_vm2, %v1582_v2  ;;  %v267_v16 = vld [vmem:[%s1707_s30 + $0x60] sm:$0xff] }
  0x23   : > { %v305_v30 = vmax.f32 %v289_v20, 0.0  ;;  %v308_v31 = vmax.f32 %v292_v21, 0.0  ;;  %v307_v32 = vmax.f32 %v291_v22, 0.0  ;;  %v293_v36 = vadd.f32 %v1704_v1, %v277_v23  ;;  %390 = vst.msk [vmem:[#allocation3 + $0x40] sm:$0x1] %vm385_vm2, %v1582_v2 }
  0x24   : > { %321 = vst.msk [vmem:[#allocation2 + $0x18] sm:$0xff] %vm250_vm0, %v304_v26  ;;  %320 = vst.msk [vmem:[#allocation2 + $0x10] sm:$0xff] %vm250_vm0, %v303_v27  ;;  %v310_v35 = vmax.f32 %v294_v29, 0.0  ;;  %v280_v37 = vmul.f32 %v1699_v0, %v264_v24  ;;  %v279_v38 = vmul.f32 %v1699_v0, %v263_v25  ;;  %v235_v39 = vmul.f32 %v1699_v0, %v227_v33  ;;  %v270_v25 = vld [vmem:[%s1707_s30 + $0x78] sm:$0xff]  ;;  %v269_v26 = vld [vmem:[%s1707_s30 + $0x70] sm:$0xff]  ;;  %s216_s30 = sadd.s32 8, %s1710_s5 }
  0x25   : > { %323 = vst.msk [vmem:[#allocation2 + $0x28] sm:$0xff] %vm250_vm0, %v306_v28  ;;  %322 = vst.msk [vmem:[#allocation2 + $0x20] sm:$0xff] %vm250_vm0, %v305_v30  ;;  %v236_v40 = vmul.f32 %v1699_v0, %v228_v34  ;;  %v309_v41 = vmax.f32 %v293_v36, 0.0  ;;  %v247_v46 = vstv %s221_s11  ;;  %v282_v3 = vmul.f32 %v1699_v0, %v266_v63  ;;  %p217_p1 = scmp.lt.s32.totalorder %s216_s30, 15  ;;  %p222_p2 = scmp.lt.s32.totalorder %s216_s30, 16 }
  0x26   : > { %325 = vst.msk [vmem:[#allocation2 + $0x38] sm:$0xff] %vm250_vm0, %v308_v31  ;;  %324 = vst.msk [vmem:[#allocation2 + $0x30] sm:$0xff] %vm250_vm0, %v307_v32  ;;  %v296_v42 = vadd.f32 %v1704_v1, %v280_v37  ;;  %v295_v43 = vadd.f32 %v1704_v1, %v279_v38  ;;  %v243_v44 = vadd.f32 %v1704_v1, %v235_v39  ;;  %v1588_v14 = vmov 0.0|0.0  }
  0x27   : > { %327 = vst.msk [vmem:[#allocation2 + $0x48] sm:$0xff] %vm250_vm0, %v310_v35  ;;  %v244_v45 = vadd.f32 %v1704_v1, %v236_v40  ;;  %326 = vst.msk [vmem:[#allocation2 + $0x40] sm:$0xff] %vm250_vm0, %v309_v41  ;;  %v281_v5 = vmul.f32 %v1699_v0, %v265_v4  ;;  %v298_v8 = vadd.f32 %v1704_v1, %v282_v3  ;;  %1370 = vmatprep.subr.bf16.mxu0 %v1588_v14  ;;  %s218_s10 = scalar_select %p217_p1, %s216_s30, 15 }
  0x28   : > { %v312_v47 = vmax.f32 %v296_v42, 0.0  ;;  %v311_v48 = vmax.f32 %v295_v43, 0.0  ;;  %v245_v49 = vmax.f32 %v243_v44, 0.0  ;;  %391 = vst.msk [vmem:[#allocation3 + $0x50] sm:$0x1] %vm385_vm2, %v1582_v2  ;;  %v284_v17 = vmul.f32 %v1699_v0, %v268_v15 }
  0x29   : > { %v246_v50 = vmax.f32 %v244_v45, 0.0  ;;  %392 = vst.msk [vmem:[#allocation3 + $0x60] sm:$0x1] %vm385_vm2, %v1582_v2  ;;  %393 = vst.msk [vmem:[#allocation3 + $0x70] sm:$0x1] %vm385_vm2, %v1582_v2  ;;  %v297_v9 = vadd.f32 %v1704_v1, %v281_v5  ;;  %v314_v10 = vmax.f32 %v298_v8, 0.0  ;;  %v283_v18 = vmul.f32 %v1699_v0, %v267_v16 }
  0x2a   : > { %329 = vst.msk [vmem:[#allocation2 + $0x58] sm:$0xff] %vm250_vm0, %v312_v47  ;;  %328 = vst.msk [vmem:[#allocation2 + $0x50] sm:$0xff] %vm250_vm0, %v311_v48  ;;  %v248_v54 = vmul.f32 %v247_v46, %v245_v49  ;;  %v300_v19 = vadd.f32 %v1704_v1, %v284_v17  ;;  %v286_v27 = vmul.f32 %v1699_v0, %v270_v25  ;;  %s1293_s11 = sshll.u32 %s218_s10, 4  ;;  %vm2408_vm2 = vcmask 294144  }
  0x2b   : > { %v1762_v51 = vld [vmem:[#allocation2 + $0x18] sm:$0xff]  ;;  %v1764_v52 = vld [vmem:[#allocation2 + $0x10] sm:$0xff]  ;;  %v249_v55 = vmul.f32 %v247_v46, %v246_v50  ;;  %v313_v11 = vmax.f32 %v297_v9, 0.0  ;;  %331 = vst.msk [vmem:[#allocation2 + $0x68] sm:$0xff] %vm250_vm0, %v314_v10  ;;  %v299_v20 = vadd.f32 %v1704_v1, %v283_v18  ;;  %v285_v28 = vmul.f32 %v1699_v0, %v269_v26  ;;  %s223_s5 = scalar_select %p222_p2, 1, 0 }
  0x2c   : > { %v1766_v53 = vld [vmem:[#allocation2 + $0x28] sm:$0xff]  ;;  %584 = vrot.lane.b32.xlu1 %v1762_v51, %s1580_s12  ;;  %582 = vrot.lane.b32.xlu0 %v1764_v52, %s1580_s12  ;;  %v1772_v56 = vld [vmem:[#allocation2 + $0x20] sm:$0xff]  ;;  %372 = vst.msk [vmem:[#allocation3 + $0x19] sm:$0x7f] %vm369_vm1, %v1762_v51  ;;  %v316_v21 = vmax.f32 %v300_v19, 0.0  ;;  %v302_v29 = vadd.f32 %v1704_v1, %v286_v27 }
  0x2d   : > { %371 = vst.msk [vmem:[#allocation3 + $0x11] sm:$0xff] %vm250_vm0, %v1764_v52  ;;  %v1778_v57 = vld [vmem:[#allocation2 + $0x38] sm:$0xff]  ;;  %v1780_v58 = vld [vmem:[#allocation2 + $0x30] sm:$0xff]  ;;  %251 = vst.msk [vmem:[#allocation2] sm:$0xff] %vm250_vm0, %v248_v54  ;;  %v315_v22 = vmax.f32 %v299_v20, 0.0  ;;  %v301_v30 = vadd.f32 %v1704_v1, %v285_v28 }
  0x2e   : > { %374 = vst.msk [vmem:[#allocation3 + $0x29] sm:$0x7f] %vm369_vm1, %v1766_v53  ;;  %v1788_v59 = vld [vmem:[#allocation2 + $0x48] sm:$0xff]  ;;  %376 = vst.msk [vmem:[#allocation3 + $0x39] sm:$0x7f] %vm369_vm1, %v1778_v57  ;;  %v1796_v60 = vld [vmem:[#allocation2 + $0x40] sm:$0xff] }
  0x2f   : > { %252 = vst.msk [vmem:[#allocation2 + $0x8] sm:$0xff] %vm250_vm0, %v249_v55  ;;  %373 = vst.msk [vmem:[#allocation3 + $0x21] sm:$0xff] %vm250_vm0, %v1772_v56  ;;  %v318_v31 = vmax.f32 %v302_v29, 0.0  ;;  %v317_v32 = vmax.f32 %v301_v30, 0.0 }
  0x30   : > { %375 = vst.msk [vmem:[#allocation3 + $0x31] sm:$0xff] %vm250_vm0, %v1780_v58  ;;  %659 = vrot.lane.b32.xlu1 %v1762_v51, %s1581_s14  ;;  %657 = vrot.lane.b32.xlu0 %v1764_v52, %s1581_s14  ;;  %377 = vst.msk [vmem:[#allocation3 + $0x41] sm:$0xff] %vm250_vm0, %v1796_v60 }
  0x31   : > { %378 = vst.msk [vmem:[#allocation3 + $0x49] sm:$0x7f] %vm369_vm1, %v1788_v59  ;;  %v1804_v61 = vld [vmem:[#allocation2 + $0x58] sm:$0xff]  ;;  %v1806_v62 = vld [vmem:[#allocation2 + $0x50] sm:$0xff] }
  0x32   : > { %380 = vst.msk [vmem:[#allocation3 + $0x59] sm:$0x7f] %vm369_vm1, %v1804_v61  ;;  %v1844_v12 = vld [vmem:[#allocation2 + $0x68] sm:$0xff] }
  0x33   : > { %379 = vst.msk [vmem:[#allocation3 + $0x51] sm:$0xff] %vm250_vm0, %v1806_v62  ;;  %330 = vst.msk [vmem:[#allocation2 + $0x60] sm:$0xff] %vm250_vm0, %v313_v11 }
  0x34   : > { %724 = vrot.lane.b32.xlu1 %v1762_v51, %s1583_s23  ;;  %722 = vrot.lane.b32.xlu0 %v1764_v52, %s1583_s23  ;;  %v352_v6 = vld [vmem:[#allocation2] sm:$0xff]  ;;  %382 = vst.msk [vmem:[#allocation3 + $0x69] sm:$0x7f] %vm369_vm1, %v1844_v12 }
  0x35   : > { %368 = vst.msk [vmem:[#allocation3 + $0x1] sm:$0xff] %vm250_vm0, %v352_v6  ;;  %333 = vst.msk [vmem:[#allocation2 + $0x78] sm:$0xff] %vm250_vm0, %v316_v21 }
  0x36   : > { %v353_v7 = vld [vmem:[#allocation2 + $0x8] sm:$0xff]  ;;  %332 = vst.msk [vmem:[#allocation2 + $0x70] sm:$0xff] %vm250_vm0, %v315_v22  ;;  %335 = vst.msk [vmem:[#allocation2 + $0x88] sm:$0xff] %vm250_vm0, %v318_v31 }
  0x37   : > { %370 = vst.msk [vmem:[#allocation3 + $0x9] sm:$0x7f] %vm369_vm1, %v353_v7 }
  0x38   : > { %832 = vrot.lane.b32.xlu1 %v1766_v53, %s2403_s24  ;;  %830 = vrot.lane.b32.xlu0 %v1772_v56, %s2403_s24  ;;  %334 = vst.msk [vmem:[#allocation2 + $0x80] sm:$0xff] %vm250_vm0, %v317_v32 }
  0x3a   : > { %v1846_v13 = vld [vmem:[#allocation2 + $0x60] sm:$0xff] }
  0x3b   : > { %381 = vst.msk [vmem:[#allocation3 + $0x61] sm:$0xff] %vm250_vm0, %v1846_v13 }
  0x3c   : > { %907 = vrot.lane.b32.xlu1 %v1766_v53, %s1585_s27  ;;  %905 = vrot.lane.b32.xlu0 %v1772_v56, %s1585_s27  ;;  %v1891_v23 = vld [vmem:[#allocation2 + $0x78] sm:$0xff] }
  0x3d   : > { %v1893_v24 = vld [vmem:[#allocation2 + $0x70] sm:$0xff]  ;;  %384 = vst.msk [vmem:[#allocation3 + $0x79] sm:$0x7f] %vm369_vm1, %v1891_v23  ;;  %vm953_vm1 = vcmask 261344  }
  0x3e   : > { %383 = vst.msk [vmem:[#allocation3 + $0x71] sm:$0xff] %vm250_vm0, %v1893_v24 }
  0x40   : > { %475 = vrot.lane.b32.xlu1 %v352_v6, %s1586_s6  ;;  %410 = vrot.lane.b32.xlu0 %v352_v6, %s1587_s8 }
  0x44   : > { %477 = vrot.lane.b32.xlu1 %v353_v7, %s1586_s6  ;;  %412 = vrot.lane.b32.xlu0 %v353_v7, %s1587_s8 }
  0x48   : > { %972 = vrot.lane.b32.xlu1 %v1766_v53, %s1589_s9  ;;  %970 = vrot.lane.b32.xlu0 %v1772_v56, %s1589_s9 }
  0x4c   : > { %416 = vrot.lane.b32.xlu1 %v1762_v51, %s1587_s8  ;;  %414 = vrot.lane.b32.xlu0 %v1764_v52, %s1587_s8 }
  0x50   : > { %481 = vrot.lane.b32.xlu1 %v1762_v51, %s1586_s6  ;;  %479 = vrot.lane.b32.xlu0 %v1764_v52, %s1586_s6 }
  0x54   : > { %588 = vrot.lane.b32.xlu1 %v1766_v53, %s1580_s12  ;;  %586 = vrot.lane.b32.xlu0 %v1772_v56, %s1580_s12 }
  0x58   : > { %663 = vrot.lane.b32.xlu1 %v1766_v53, %s1581_s14  ;;  %661 = vrot.lane.b32.xlu0 %v1772_v56, %s1581_s14 }
  0x5c   : > { %728 = vrot.lane.b32.xlu1 %v1766_v53, %s1583_s23  ;;  %726 = vrot.lane.b32.xlu0 %v1772_v56, %s1583_s23 }
  0x60   : > { %836 = vrot.lane.b32.xlu1 %v1778_v57, %s2403_s24  ;;  %834 = vrot.lane.b32.xlu0 %v1780_v58, %s2403_s24 }
  0x64   : > { %911 = vrot.lane.b32.xlu1 %v1778_v57, %s1585_s27  ;;  %909 = vrot.lane.b32.xlu0 %v1780_v58, %s1585_s27 }
  0x68   : > { %976 = vrot.lane.b32.xlu1 %v1778_v57, %s1589_s9  ;;  %974 = vrot.lane.b32.xlu0 %v1780_v58, %s1589_s9 }
  0x6c   : > { %420 = vrot.lane.b32.xlu1 %v1766_v53, %s1587_s8  ;;  %418 = vrot.lane.b32.xlu0 %v1772_v56, %s1587_s8 }
  0x70   : > { %485 = vrot.lane.b32.xlu1 %v1766_v53, %s1586_s6  ;;  %483 = vrot.lane.b32.xlu0 %v1772_v56, %s1586_s6 }
  0x74   : > { %592 = vrot.lane.b32.xlu1 %v1778_v57, %s1580_s12  ;;  %590 = vrot.lane.b32.xlu0 %v1780_v58, %s1580_s12 }
  0x78   : > { %667 = vrot.lane.b32.xlu1 %v1778_v57, %s1581_s14  ;;  %665 = vrot.lane.b32.xlu0 %v1780_v58, %s1581_s14 }
  0x7c   : > { %732 = vrot.lane.b32.xlu1 %v1778_v57, %s1583_s23  ;;  %730 = vrot.lane.b32.xlu0 %v1780_v58, %s1583_s23 }
  0x80   : > { %840 = vrot.lane.b32.xlu1 %v1788_v59, %s2403_s24  ;;  %838 = vrot.lane.b32.xlu0 %v1796_v60, %s2403_s24  ;;  %s337_s24 = scalar_lea.vmem %s1694_s13, %s1293_s11  ;;  %s224_s13 = scvt.s32.f32 %s223_s5 }
  0x81   : > { %v339_v33 = vld [vmem:[%s337_s24 + $0x8] sm:$0xff]  ;;  %v338_v34 = vld [vmem:[%s337_s24] sm:$0xff]  ;;  %s2415_s24 = smov 24  }
  0x82   : > { %v341_v35 = vmul.f32 %v1699_v0, %v339_v33  ;;  %v340_v36 = vmul.f32 %v1699_v0, %v338_v34  ;;  %v346_v41 = vstv %s224_s13 }
  0x84   : > { %915 = vrot.lane.b32.xlu1 %v1788_v59, %s1585_s27  ;;  %913 = vrot.lane.b32.xlu0 %v1796_v60, %s1585_s27  ;;  %v343_v37 = vadd.f32 %v1704_v1, %v341_v35  ;;  %v342_v38 = vadd.f32 %v1704_v1, %v340_v36 }
  0x86   : > { %v345_v39 = vmax.f32 %v343_v37, 0.0  ;;  %v344_v40 = vmax.f32 %v342_v38, 0.0 }
  0x88   : > { %980 = vrot.lane.b32.xlu1 %v1788_v59, %s1589_s9  ;;  %978 = vrot.lane.b32.xlu0 %v1796_v60, %s1589_s9  ;;  %v348_v42 = vmul.f32 %v346_v41, %v345_v39  ;;  %v347_v43 = vmul.f32 %v346_v41, %v344_v40  ;;  %v811_v39 = vld [vmem:[#allocation2 + $0x88] sm:$0xff]  ;;  %v810_v40 = vld [vmem:[#allocation2 + $0x80] sm:$0xff] }
  0x8a   : > { %351 = vst.msk [vmem:[#allocation2 + $0x98] sm:$0xff] %vm250_vm0, %v348_v42  ;;  %350 = vst.msk [vmem:[#allocation2 + $0x90] sm:$0xff] %vm250_vm0, %v347_v43  ;;  %vm896_vm0 = vcmask 221376  }
  0x8c   : > { %424 = vrot.lane.b32.xlu1 %v1778_v57, %s1587_s8  ;;  %422 = vrot.lane.b32.xlu0 %v1780_v58, %s1587_s8 }
  0x90   : > { %489 = vrot.lane.b32.xlu1 %v1778_v57, %s1586_s6  ;;  %487 = vrot.lane.b32.xlu0 %v1780_v58, %s1586_s6 }
  0x94   : > { %596 = vrot.lane.b32.xlu1 %v1788_v59, %s1580_s12  ;;  %594 = vrot.lane.b32.xlu0 %v1796_v60, %s1580_s12 }
  0x98   : > { %671 = vrot.lane.b32.xlu1 %v1788_v59, %s1581_s14  ;;  %669 = vrot.lane.b32.xlu0 %v1796_v60, %s1581_s14 }
  0x9c   : > { %736 = vrot.lane.b32.xlu1 %v1788_v59, %s1583_s23  ;;  %734 = vrot.lane.b32.xlu0 %v1796_v60, %s1583_s23 }
  0x9e   : > { %v585_v0 = vpop.permute.xlu1 %584  ;;  %v583_v1 = vpop.permute.xlu0 %582 }
  0xa0   : > { %844 = vrot.lane.b32.xlu1 %v1804_v61, %s2415_s24  ;;  %842 = vrot.lane.b32.xlu0 %v1806_v62, %s2415_s24 }
  0xa2   : > { %v660_v44 = vpop.permute.xlu1 %659  ;;  %v658_v45 = vpop.permute.xlu0 %657 }
  0xa4   : > { %919 = vrot.lane.b32.xlu1 %v1804_v61, %s1585_s27  ;;  %917 = vrot.lane.b32.xlu0 %v1806_v62, %s1585_s27 }
  0xa6   : > { %v725_v46 = vpop.permute.xlu1 %724  ;;  %v723_v47 = vpop.permute.xlu0 %722 }
  0xa8   : > { %984 = vrot.lane.b32.xlu1 %v1804_v61, %s1589_s9  ;;  %982 = vrot.lane.b32.xlu0 %v1806_v62, %s1589_s9 }
  0xaa   : > { %v833_v48 = vpop.permute.xlu1 %832  ;;  %v831_v49 = vpop.permute.xlu0 %830 }
  0xac   : > { %428 = vrot.lane.b32.xlu1 %v1788_v59, %s1587_s8  ;;  %426 = vrot.lane.b32.xlu0 %v1796_v60, %s1587_s8 }
  0xae   : > { %v908_v50 = vpop.permute.xlu1 %907  ;;  %v906_v51 = vpop.permute.xlu0 %905 }
  0xb0   : > { %493 = vrot.lane.b32.xlu1 %v1788_v59, %s1586_s6  ;;  %491 = vrot.lane.b32.xlu0 %v1796_v60, %s1586_s6 }
  0xb2   : > { %v476_v52 = vpop.permute.xlu1 %475  ;;  %v411_v53 = vpop.permute.xlu0 %410 }
  0xb3   : > { %459 = vst.msk [vmem:[#allocation3] sm:$0xff] %vm458_vm3, %v411_v53 }
  0xb4   : > { %524 = vst.msk [vmem:[#allocation3 - $0x1] sm:$0xfe] %vm523_vm4, %v476_v52  ;;  %600 = vrot.lane.b32.xlu1 %v1804_v61, %s1580_s12  ;;  %598 = vrot.lane.b32.xlu0 %v1806_v62, %s1580_s12 }
  0xb5   : > { %649 = vst.msk [vmem:[#allocation3] sm:$0x1] %vm2405_vm5, %v1582_v2  ;;  %vm2412_vm5 = vcmask 286976  }
  0xb6   : > { %v478_v54 = vpop.permute.xlu1 %477  ;;  %v413_v55 = vpop.permute.xlu0 %412 }
  0xb7   : > { %460 = vst.msk [vmem:[#allocation3 + $0x8] sm:$0xff] %vm458_vm3, %v413_v55 }
  0xb8   : > { %526 = vst.msk [vmem:[#allocation3 + $0x7] sm:$0xff] %vm2409_vm6, %v478_v54  ;;  %675 = vrot.lane.b32.xlu1 %v1804_v61, %s1581_s14  ;;  %673 = vrot.lane.b32.xlu0 %v1806_v62, %s1581_s14 }
  0xb9   : > { %542 = vst.msk [vmem:[#allocation3 + $0xf] sm:$0x1] %vm2411_vm7, %v1582_v2 }
  0xba   : > { %631 = vst.msk [vmem:[#allocation3 + $0x1] sm:$0xff] %vm2406_vm8, %v583_v1  ;;  %v973_v56 = vpop.permute.xlu1 %972  ;;  %v971_v57 = vpop.permute.xlu0 %970  ;;  %vm2407_vm8 = vcmask 294145  }
  0xbb   : > { %633 = vst.msk [vmem:[#allocation3 + $0x9] sm:$0x7f] %vm632_vm9, %v585_v0 }
  0xbc   : > { %706 = vst.msk [vmem:[#allocation3] sm:$0xff] %vm705_vm10, %v658_v45  ;;  %707 = vst.msk [vmem:[#allocation3 + $0x8] sm:$0xff] %vm705_vm10, %v660_v44  ;;  %740 = vrot.lane.b32.xlu1 %v1804_v61, %s1583_s23  ;;  %738 = vrot.lane.b32.xlu0 %v1806_v62, %s1583_s23 }
  0xbd   : > { %771 = vst.msk [vmem:[#allocation3 - $0x1] sm:$0xfe] %vm770_vm11, %v723_v47 }
  0xbe   : > { %773 = vst.msk [vmem:[#allocation3 + $0x7] sm:$0xff] %vm772_vm12, %v725_v46  ;;  %v417_v58 = vpop.permute.xlu1 %416  ;;  %v415_v59 = vpop.permute.xlu0 %414 }
  0xbf   : > { %789 = vst.msk [vmem:[#allocation3 + $0xf] sm:$0x1] %vm788_vm13, %v1582_v2 }
  0xc0   : > { %879 = vst.msk [vmem:[#allocation3 + $0x1] sm:$0xff] %vm878_vm14, %v831_v49  ;;  %848 = vrot.lane.b32.xlu1 %v1844_v12, %s2415_s24  ;;  %846 = vrot.lane.b32.xlu0 %v1846_v13, %s2415_s24 }
  0xc1   : > { %881 = vst.msk [vmem:[#allocation3 + $0x9] sm:$0x7f] %vm880_vm15, %v833_v48 }
  0xc2   : > { %897 = vst.msk [vmem:[#allocation3] sm:$0x1] %vm896_vm0, %v1582_v2  ;;  %v482_v60 = vpop.permute.xlu1 %481  ;;  %v480_v63 = vpop.permute.xlu0 %479 }
  0xc3   : > { %954 = vst.msk [vmem:[#allocation3] sm:$0xff] %vm953_vm1, %v906_v51  ;;  %955 = vst.msk [vmem:[#allocation3 + $0x8] sm:$0xff] %vm953_vm1, %v908_v50 }
  0xc4   : > { %1021 = vst.msk [vmem:[#allocation3 + $0x7] sm:$0xff] %vm2408_vm2, %v973_v56  ;;  %vm2416_vm2 = vcmask 122976   ;;  %923 = vrot.lane.b32.xlu1 %v1844_v12, %s1585_s27  ;;  %921 = vrot.lane.b32.xlu0 %v1846_v13, %s1585_s27  ;;  %v813_v56 = vld [vmem:[#allocation2 + $0x98] sm:$0xff] }
  0xc5   : > { %1037 = vst.msk [vmem:[#allocation3 + $0xf] sm:$0x1] %vm2412_vm5, %v1582_v2 }
  0xc6   : > { %1019 = vst.msk [vmem:[#allocation3 - $0x1] sm:$0xfe] %vm2407_vm8, %v971_v57  ;;  %vm2410_vm8 = vcmask 293888   ;;  %v589_v5 = vpop.permute.xlu1 %588  ;;  %v587_v6 = vpop.permute.xlu0 %586  ;;  %v812_v57 = vld [vmem:[#allocation2 + $0x90] sm:$0xff] }
  0xc7   : > { %462 = vst.msk [vmem:[#allocation3 + $0x18] sm:$0xff] %vm458_vm3, %v417_v58  ;;  %461 = vst.msk [vmem:[#allocation3 + $0x10] sm:$0xff] %vm458_vm3, %v415_v59 }
  0xc8   : > { %543 = vst.msk [vmem:[#allocation3 + $0x1f] sm:$0x1] %vm2411_vm7, %v1582_v2  ;;  %988 = vrot.lane.b32.xlu1 %v1844_v12, %s1589_s9  ;;  %986 = vrot.lane.b32.xlu0 %v1846_v13, %s1589_s9 }
  0xc9   : > { %528 = vst.msk [vmem:[#allocation3 + $0x17] sm:$0xff] %vm2409_vm6, %v482_v60  ;;  %vm2051_vm6 = vmpackc.low %vm2410_vm8, %vm2410_vm8  ;;  %vm2421_vm8 = vcmask 294145  }
  0xca   : > { %527 = vst.msk [vmem:[#allocation3 + $0xf] sm:$0xfe] %vm523_vm4, %v480_v63  ;;  %v664_v9 = vpop.permute.xlu1 %663  ;;  %v662_v10 = vpop.permute.xlu0 %661 }
  0xcb   : > { %650 = vst.msk [vmem:[#allocation3 + $0x10] sm:$0x1] %vm2416_vm2, %v1582_v2  ;;  %vm2419_vm2 = vcmask 130144  }
  0xcc   : > { %v1046_v4 = vld [vmem:[#allocation3 + $0x8] sm:$0xff]  ;;  %635 = vst.msk [vmem:[#allocation3 + $0x19] sm:$0x7f] %vm632_vm9, %v589_v5  ;;  %432 = vrot.lane.b32.xlu1 %v1804_v61, %s1587_s8  ;;  %430 = vrot.lane.b32.xlu0 %v1806_v62, %s1587_s8 }
  0xcd   : > { %v1045_v3 = vld [vmem:[#allocation3] sm:$0xff]  ;;  %634 = vst.msk [vmem:[#allocation3 + $0x11] sm:$0xff] %vm2419_vm2, %v587_v6  ;;  %vm2420_vm2 = vcmask 294144  }
  0xce   : > { %v1371_v7 = vpack.c.bf16 %v1046_v4, %v1045_v3  ;;  %709 = vst.msk [vmem:[#allocation3 + $0x18] sm:$0xff] %vm705_vm10, %v664_v9  ;;  %708 = vst.msk [vmem:[#allocation3 + $0x10] sm:$0xff] %vm705_vm10, %v662_v10  ;;  %v729_v11 = vpop.permute.xlu1 %728  ;;  %v727_v15 = vpop.permute.xlu0 %726 }
  0xcf   : > { %790 = vst.msk [vmem:[#allocation3 + $0x1f] sm:$0x1] %vm788_vm13, %v1582_v2 }
  0xd0   : > { %1373 = vmatpush3.bf16.xpose.msk.msra.mxu0 %vm2051_vm6, %v1371_v7  ;;  %775 = vst.msk [vmem:[#allocation3 + $0x17] sm:$0xff] %vm772_vm12, %v729_v11  ;;  %497 = vrot.lane.b32.xlu1 %v1804_v61, %s1586_s6 }
  0xd1   : > { %1374 = vmatprep.subr.bf16.mxu0 %v1588_v14  ;;  %774 = vst.msk [vmem:[#allocation3 + $0xf] sm:$0xfe] %vm770_vm11, %v727_v15  ;;  %495 = vrot.lane.b32.xlu0 %v1806_v62, %s1586_s6 }
  0xd2   : > { %898 = vst.msk [vmem:[#allocation3 + $0x10] sm:$0x1] %vm896_vm0, %v1582_v2  ;;  %v837_v16 = vpop.permute.xlu1 %836  ;;  %v835_v17 = vpop.permute.xlu0 %834 }
  0xd3   : > { %883 = vst.msk [vmem:[#allocation3 + $0x19] sm:$0x7f] %vm880_vm15, %v837_v16 }
  0xd4   : > { %882 = vst.msk [vmem:[#allocation3 + $0x11] sm:$0xff] %vm878_vm14, %v835_v17  ;;  %604 = vrot.lane.b32.xlu1 %v1844_v12, %s1580_s12 }
  0xd5   : > { %602 = vrot.lane.b32.xlu0 %v1846_v13, %s1580_s12 }
  0xd6   : > { %v912_v18 = vpop.permute.xlu1 %911  ;;  %v910_v19 = vpop.permute.xlu0 %909 }
  0xd7   : > { %957 = vst.msk [vmem:[#allocation3 + $0x18] sm:$0xff] %vm953_vm1, %v912_v18  ;;  %956 = vst.msk [vmem:[#allocation3 + $0x10] sm:$0xff] %vm953_vm1, %v910_v19 }
  0xd8   : > { %1038 = vst.msk [vmem:[#allocation3 + $0x1f] sm:$0x1] %vm2412_vm5, %v1582_v2  ;;  %679 = vrot.lane.b32.xlu1 %v1844_v12, %s1581_s14 }
  0xd9   : > { %677 = vrot.lane.b32.xlu0 %v1846_v13, %s1581_s14 }
  0xda   : > { %v977_v61 = vpop.permute.xlu1 %976  ;;  %v975_v62 = vpop.permute.xlu0 %974 }
  0xdb   : > { %1023 = vst.msk [vmem:[#allocation3 + $0x17] sm:$0xff] %vm2420_vm2, %v977_v61  ;;  %vm2423_vm2 = vcmask 122976  }
  0xdc   : > { %1022 = vst.msk [vmem:[#allocation3 + $0xf] sm:$0xfe] %vm2421_vm8, %v975_v62  ;;  %744 = vrot.lane.b32.xlu1 %v1844_v12, %s1583_s23  ;;  %vm2422_vm8 = vcmask 97344  }
  0xdd   : > { %742 = vrot.lane.b32.xlu0 %v1846_v13, %s1583_s23 }
  0xde   : > { %v421_v20 = vpop.permute.xlu1 %420  ;;  %v419_v21 = vpop.permute.xlu0 %418 }
  0xdf   : > { %464 = vst.msk [vmem:[#allocation3 + $0x28] sm:$0xff] %vm458_vm3, %v421_v20  ;;  %463 = vst.msk [vmem:[#allocation3 + $0x20] sm:$0xff] %vm458_vm3, %v419_v21 }
  0xe0   : > { %544 = vst.msk [vmem:[#allocation3 + $0x2f] sm:$0x1] %vm2411_vm7, %v1582_v2  ;;  %852 = vrot.lane.b32.xlu1 %v1891_v23, %s2415_s24 }
  0xe1   : > { %850 = vrot.lane.b32.xlu0 %v1893_v24, %s2415_s24 }
  0xe2   : > { %v486_v22 = vpop.permute.xlu1 %485  ;;  %v484_v25 = vpop.permute.xlu0 %483  ;;  %v1048_v27 = vld [vmem:[#allocation3 + $0x18] sm:$0xff] }
  0xe3   : > { %v1047_v26 = vld [vmem:[#allocation3 + $0x10] sm:$0xff]  ;;  %530 = vst.msk [vmem:[#allocation3 + $0x27] sm:$0xff] %vm2422_vm8, %v486_v22  ;;  %vm2424_vm8 = vcmask 130144  }
  0xe4   : > { %529 = vst.msk [vmem:[#allocation3 + $0x1f] sm:$0xfe] %vm523_vm4, %v484_v25  ;;  %v1375_v28 = vpack.c.bf16 %v1048_v27, %v1047_v26  ;;  %927 = vrot.lane.b32.xlu1 %v1891_v23, %s1585_s27 }
  0xe5   : > { %651 = vst.msk [vmem:[#allocation3 + $0x20] sm:$0x1] %vm2423_vm2, %v1582_v2  ;;  %925 = vrot.lane.b32.xlu0 %v1893_v24, %s1585_s27  ;;  %vm2425_vm2 = vcmask 294144  }
  0xe6   : > { %1377 = vmatpush3.bf16.xpose.msk.msra.mxu0 %vm2051_vm6, %v1375_v28  ;;  %v593_v29 = vpop.permute.xlu1 %592  ;;  %v591_v30 = vpop.permute.xlu0 %590 }
  0xe7   : > { %1378 = vmatprep.subr.bf16.mxu0 %v1588_v14  ;;  %637 = vst.msk [vmem:[#allocation3 + $0x29] sm:$0x7f] %vm632_vm9, %v593_v29 }
  0xe8   : > { %636 = vst.msk [vmem:[#allocation3 + $0x21] sm:$0xff] %vm2424_vm8, %v591_v30  ;;  %992 = vrot.lane.b32.xlu1 %v1891_v23, %s1589_s9  ;;  %vm2426_vm8 = vcmask 294145  }
  0xe9   : > { %990 = vrot.lane.b32.xlu0 %v1893_v24, %s1589_s9 }
  0xea   : > { %v668_v31 = vpop.permute.xlu1 %667  ;;  %v666_v32 = vpop.permute.xlu0 %665 }
  0xeb   : > { %711 = vst.msk [vmem:[#allocation3 + $0x28] sm:$0xff] %vm705_vm10, %v668_v31  ;;  %710 = vst.msk [vmem:[#allocation3 + $0x20] sm:$0xff] %vm705_vm10, %v666_v32 }
  0xec   : > { %791 = vst.msk [vmem:[#allocation3 + $0x2f] sm:$0x1] %vm788_vm13, %v1582_v2  ;;  %436 = vrot.lane.b32.xlu1 %v1844_v12, %s1587_s8 }
  0xed   : > { %434 = vrot.lane.b32.xlu0 %v1846_v13, %s1587_s8 }
  0xee   : > { %v733_v33 = vpop.permute.xlu1 %732  ;;  %v731_v34 = vpop.permute.xlu0 %730 }
  0xef   : > { %777 = vst.msk [vmem:[#allocation3 + $0x27] sm:$0xff] %vm772_vm12, %v733_v33 }
  0xf0   : > { %776 = vst.msk [vmem:[#allocation3 + $0x1f] sm:$0xfe] %vm770_vm11, %v731_v34  ;;  %501 = vrot.lane.b32.xlu1 %v1844_v12, %s1586_s6 }
  0xf1   : > { %899 = vst.msk [vmem:[#allocation3 + $0x20] sm:$0x1] %vm896_vm0, %v1582_v2  ;;  %499 = vrot.lane.b32.xlu0 %v1846_v13, %s1586_s6 }
  0xf2   : > { %v841_v35 = vpop.permute.xlu1 %840  ;;  %v839_v36 = vpop.permute.xlu0 %838 }
  0xf3   : > { %885 = vst.msk [vmem:[#allocation3 + $0x29] sm:$0x7f] %vm880_vm15, %v841_v35 }
  0xf4   : > { %884 = vst.msk [vmem:[#allocation3 + $0x21] sm:$0xff] %vm878_vm14, %v839_v36  ;;  %608 = vrot.lane.b32.xlu1 %v1891_v23, %s1580_s12 }
  0xf5   : > { %606 = vrot.lane.b32.xlu0 %v1893_v24, %s1580_s12 }
  0xf6   : > { %v916_v37 = vpop.permute.xlu1 %915  ;;  %v914_v38 = vpop.permute.xlu0 %913 }
  0xf7   : > { %959 = vst.msk [vmem:[#allocation3 + $0x28] sm:$0xff] %vm953_vm1, %v916_v37  ;;  %958 = vst.msk [vmem:[#allocation3 + $0x20] sm:$0xff] %vm953_vm1, %v914_v38 }
  0xf8   : > { %1039 = vst.msk [vmem:[#allocation3 + $0x2f] sm:$0x1] %vm2412_vm5, %v1582_v2  ;;  %683 = vrot.lane.b32.xlu1 %v1891_v23, %s1581_s14 }
  0xf9   : > { %681 = vrot.lane.b32.xlu0 %v1893_v24, %s1581_s14 }
  0xfa   : > { %v981_v12 = vpop.permute.xlu1 %980  ;;  %v979_v13 = vpop.permute.xlu0 %978 }
  0xfb   : > { %1025 = vst.msk [vmem:[#allocation3 + $0x27] sm:$0xff] %vm2425_vm2, %v981_v12  ;;  %vm2427_vm2 = vcmask 97344  }
  0xfc   : > { %1024 = vst.msk [vmem:[#allocation3 + $0x1f] sm:$0xfe] %vm2426_vm8, %v979_v13  ;;  %748 = vrot.lane.b32.xlu1 %v1891_v23, %s1583_s23  ;;  %vm2428_vm8 = vcmask 122976  }
  0xfd   : > { %746 = vrot.lane.b32.xlu0 %v1893_v24, %s1583_s23 }
  0xfe   : > { %v425_v41 = vpop.permute.xlu1 %424  ;;  %v423_v42 = vpop.permute.xlu0 %422 }
  0xff   : > { %466 = vst.msk [vmem:[#allocation3 + $0x38] sm:$0xff] %vm458_vm3, %v425_v41  ;;  %465 = vst.msk [vmem:[#allocation3 + $0x30] sm:$0xff] %vm458_vm3, %v423_v42 }
 0x100   : > { %545 = vst.msk [vmem:[#allocation3 + $0x3f] sm:$0x1] %vm2411_vm7, %v1582_v2  ;;  %856 = vrot.lane.b32.xlu1 %v811_v39, %s2415_s24 }
 0x101   : > { %854 = vrot.lane.b32.xlu0 %v810_v40, %s2415_s24 }
 0x102   : > { %v490_v43 = vpop.permute.xlu1 %489  ;;  %v488_v0 = vpop.permute.xlu0 %487  ;;  %v1050_v44 = vld [vmem:[#allocation3 + $0x28] sm:$0xff] }
 0x103   : > { %v1049_v1 = vld [vmem:[#allocation3 + $0x20] sm:$0xff]  ;;  %532 = vst.msk [vmem:[#allocation3 + $0x37] sm:$0xff] %vm2427_vm2, %v490_v43  ;;  %vm2429_vm2 = vcmask 130144  }
 0x104   : > { %531 = vst.msk [vmem:[#allocation3 + $0x2f] sm:$0xfe] %vm523_vm4, %v488_v0  ;;  %v1379_v45 = vpack.c.bf16 %v1050_v44, %v1049_v1  ;;  %931 = vrot.lane.b32.xlu1 %v811_v39, %s1585_s27 }
 0x105   : > { %652 = vst.msk [vmem:[#allocation3 + $0x30] sm:$0x1] %vm2428_vm8, %v1582_v2  ;;  %929 = vrot.lane.b32.xlu0 %v810_v40, %s1585_s27  ;;  %vm2430_vm8 = vcmask 294144  }
 0x106   : > { %1381 = vmatpush3.bf16.xpose.msk.msra.mxu0 %vm2051_vm6, %v1379_v45  ;;  %v597_v46 = vpop.permute.xlu1 %596  ;;  %v595_v47 = vpop.permute.xlu0 %594 }
 0x107   : > { %1382 = vmatprep.subr.bf16.mxu0 %v1588_v14  ;;  %639 = vst.msk [vmem:[#allocation3 + $0x39] sm:$0x7f] %vm632_vm9, %v597_v46 }
 0x108   : > { %638 = vst.msk [vmem:[#allocation3 + $0x31] sm:$0xff] %vm2429_vm2, %v595_v47  ;;  %996 = vrot.lane.b32.xlu1 %v811_v39, %s1589_s9  ;;  %vm2431_vm2 = vcmask 294145  }
 0x109   : > { %994 = vrot.lane.b32.xlu0 %v810_v40, %s1589_s9 }
 0x10a   : > { %v672_v48 = vpop.permute.xlu1 %671  ;;  %v670_v49 = vpop.permute.xlu0 %669 }
 0x10b   : > { %713 = vst.msk [vmem:[#allocation3 + $0x38] sm:$0xff] %vm705_vm10, %v672_v48  ;;  %712 = vst.msk [vmem:[#allocation3 + $0x30] sm:$0xff] %vm705_vm10, %v670_v49 }
 0x10c   : > { %792 = vst.msk [vmem:[#allocation3 + $0x3f] sm:$0x1] %vm788_vm13, %v1582_v2  ;;  %440 = vrot.lane.b32.xlu1 %v1891_v23, %s1587_s8 }
 0x10d   : > { %438 = vrot.lane.b32.xlu0 %v1893_v24, %s1587_s8 }
 0x10e   : > { %v737_v50 = vpop.permute.xlu1 %736  ;;  %v735_v51 = vpop.permute.xlu0 %734 }
 0x10f   : > { %779 = vst.msk [vmem:[#allocation3 + $0x37] sm:$0xff] %vm772_vm12, %v737_v50 }
 0x110   : > { %778 = vst.msk [vmem:[#allocation3 + $0x2f] sm:$0xfe] %vm770_vm11, %v735_v51  ;;  %505 = vrot.lane.b32.xlu1 %v1891_v23, %s1586_s6 }
 0x111   : > { %900 = vst.msk [vmem:[#allocation3 + $0x30] sm:$0x1] %vm896_vm0, %v1582_v2  ;;  %503 = vrot.lane.b32.xlu0 %v1893_v24, %s1586_s6  ;;  %s1312_s6 = sshll.u32 %s1566_s19, 1 }
 0x112   : > { %v845_v52 = vpop.permute.xlu1 %844  ;;  %v843_v53 = vpop.permute.xlu0 %842  ;;  %s1197_s8 = sadd.s32 %s1562_s18, %s1312_s6  ;;  %s1591_s18 = smov [#allocation4]  }
 0x113   : > { %887 = vst.msk [vmem:[#allocation3 + $0x39] sm:$0x7f] %vm880_vm15, %v845_v52  ;;  %s1313_s10 = sshll.u32 %s1197_s8, 7  ;;  %s1488_s19 = sshll.u32 %s1591_s18, 4  ;;  %s1489_s19 = int_to_ptr.vmem [resolvable:$false] %s1488_s19 }
 0x114   : > { %886 = vst.msk [vmem:[#allocation3 + $0x31] sm:$0xff] %vm878_vm14, %v843_v53  ;;  %612 = vrot.lane.b32.xlu1 %v811_v39, %s1580_s12  ;;  %s2347_s13 = scalar_lea.hbm %s2402_s4, %s1313_s10 }
 0x115   : > { %610 = vrot.lane.b32.xlu0 %v810_v40, %s1580_s12 }
 0x116   : > { %v920_v54 = vpop.permute.xlu1 %919  ;;  %v918_v55 = vpop.permute.xlu0 %917 }
 0x117   : > { %961 = vst.msk [vmem:[#allocation3 + $0x38] sm:$0xff] %vm953_vm1, %v920_v54  ;;  %960 = vst.msk [vmem:[#allocation3 + $0x30] sm:$0xff] %vm953_vm1, %v918_v55 }
 0x118   : > { %1040 = vst.msk [vmem:[#allocation3 + $0x3f] sm:$0x1] %vm2412_vm5, %v1582_v2  ;;  %687 = vrot.lane.b32.xlu1 %v811_v39, %s1581_s14 }
 0x119   : > { %685 = vrot.lane.b32.xlu0 %v810_v40, %s1581_s14  ;;  %s1490_s14 = scalar_lea.vmem %s1489_s19, 256 }
 0x11a   : > { %v985_v23 = vpop.permute.xlu1 %984  ;;  %v983_v24 = vpop.permute.xlu0 %982 }
 0x11b   : > { %1027 = vst.msk [vmem:[#allocation3 + $0x37] sm:$0xff] %vm2430_vm8, %v985_v23  ;;  %vm2432_vm8 = vcmask 97344  }
 0x11c   : > { %1026 = vst.msk [vmem:[#allocation3 + $0x2f] sm:$0xfe] %vm2431_vm2, %v983_v24  ;;  %752 = vrot.lane.b32.xlu1 %v811_v39, %s1583_s23  ;;  %vm2433_vm2 = vcmask 122976  }
 0x11d   : > { %750 = vrot.lane.b32.xlu0 %v810_v40, %s1583_s23  ;;  %s202_s23 = sand.u32 1, %s1554_s16  }
 0x11e   : > { %v429_v58 = vpop.permute.xlu1 %428  ;;  %v427_v59 = vpop.permute.xlu0 %426 }
 0x11f   : > { %468 = vst.msk [vmem:[#allocation3 + $0x48] sm:$0xff] %vm458_vm3, %v429_v58  ;;  %467 = vst.msk [vmem:[#allocation3 + $0x40] sm:$0xff] %vm458_vm3, %v427_v59 }
 0x120   : > { %546 = vst.msk [vmem:[#allocation3 + $0x4f] sm:$0x1] %vm2411_vm7, %v1582_v2  ;;  %860 = vrot.lane.b32.xlu1 %v813_v56, %s2415_s24  ;;  %vm1590_vm7 = vmmov 0  }
 0x121   : > { %858 = vrot.lane.b32.xlu0 %v812_v57, %s2415_s24  ;;  %1367 = vmatprep.mubr.msk.f32.mxu0 %vm1590_vm7, %v1582_v2  ;;  %vm2435_vm7 = vcmask 294144   ;;  %s1186_s24 = scalar_lea.sflag [#allocation5], %s202_s23 }
 0x122   : > { %v494_v60 = vpop.permute.xlu1 %493  ;;  %v492_v63 = vpop.permute.xlu0 %491  ;;  %v1052_v4 = vld [vmem:[#allocation3 + $0x38] sm:$0xff] }
 0x123   : > { %v1051_v3 = vld [vmem:[#allocation3 + $0x30] sm:$0xff]  ;;  %534 = vst.msk [vmem:[#allocation3 + $0x47] sm:$0xff] %vm2432_vm8, %v494_v60  ;;  %vm2434_vm8 = vcmask 130144  }
 0x124   : > { %533 = vst.msk [vmem:[#allocation3 + $0x3f] sm:$0xfe] %vm523_vm4, %v492_v63  ;;  %v1383_v5 = vpack.c.bf16 %v1052_v4, %v1051_v3  ;;  %935 = vrot.lane.b32.xlu1 %v813_v56, %s1585_s27 }
 0x125   : > { %653 = vst.msk [vmem:[#allocation3 + $0x40] sm:$0x1] %vm2433_vm2, %v1582_v2  ;;  %933 = vrot.lane.b32.xlu0 %v812_v57, %s1585_s27  ;;  %vm2436_vm2 = vcmask 294145   ;;  %s1284_s27 = sshll.u32 %s202_s23, 3 }
 0x126   : > { %1385 = vmatpush3.bf16.xpose.msk.msra.mxu0 %vm2051_vm6, %v1383_v5  ;;  %v601_v6 = vpop.permute.xlu1 %600  ;;  %v599_v7 = vpop.permute.xlu0 %598 }
 0x127   : > { %1386 = vmatprep.subr.bf16.mxu0 %v1588_v14  ;;  %641 = vst.msk [vmem:[#allocation3 + $0x49] sm:$0x7f] %vm632_vm9, %v601_v6 }
 0x128   : > { %640 = vst.msk [vmem:[#allocation3 + $0x41] sm:$0xff] %vm2434_vm8, %v599_v7  ;;  %1000 = vrot.lane.b32.xlu1 %v813_v56, %s1589_s9  ;;  %vm2437_vm8 = vcmask 90176  }
 0x129   : > { %998 = vrot.lane.b32.xlu0 %v812_v57, %s1589_s9  ;;  %s204_s9 = scalar_lea.vmem [#allocation4], %s1284_s27 }
 0x12a   : > { %v676_v9 = vpop.permute.xlu1 %675  ;;  %v674_v10 = vpop.permute.xlu0 %673  ;;  %s1201_s30 = sshll.u32 %s204_s9, 4  ;;  %s2342_s30 = int_to_ptr.vmem [resolvable:$true] %s1201_s30 }
 0x12b   : > { %715 = vst.msk [vmem:[#allocation3 + $0x48] sm:$0xff] %vm705_vm10, %v676_v9  ;;  %714 = vst.msk [vmem:[#allocation3 + $0x40] sm:$0xff] %vm705_vm10, %v674_v10  ;;  %s1484_s12 = scalar_lea.vmem %s2342_s30, 128  ;;  %p1491_p7 = scmp.lt.s32.totalorder %s2342_s30, %s1489_s19 }
 0x12c   : > { %793 = vst.msk [vmem:[#allocation3 + $0x4f] sm:$0x1] %vm788_vm13, %v1582_v2  ;;  %p1485_p4 = scmp.ne.s32.totalorder %s2342_s30, %s1484_s12  ;;  %p1492_p9 = scmp.lt.s32.totalorder %s1490_s14, %s1484_s12 }
 0x12e   : > { %v741_v11 = vpop.permute.xlu1 %740  ;;  %v739_v15 = vpop.permute.xlu0 %738  ;;  %p1486_p5 = pnand %p1485_p4, %p1668_p3  ;;  %p1493_p10 = por %p1492_p9, %p1491_p7 }
 0x12f   : > { %781 = vst.msk [vmem:[#allocation3 + $0x47] sm:$0xff] %vm772_vm12, %v741_v11 }
 0x130   : > { %780 = vst.msk [vmem:[#allocation3 + $0x3f] sm:$0xfe] %vm770_vm11, %v739_v15  ;;  %p1487_p6 = pneg %p1486_p5 }
 0x131   : > { %901 = vst.msk [vmem:[#allocation3 + $0x40] sm:$0x1] %vm896_vm0, %v1582_v2 }
 0x132   : > { %v849_v16 = vpop.permute.xlu1 %848  ;;  %v847_v17 = vpop.permute.xlu0 %846  ;;  %p1494_p11 = pnand %p1493_p10, %p1487_p6 }
 0x133   : > { %889 = vst.msk [vmem:[#allocation3 + $0x49] sm:$0x7f] %vm880_vm15, %v849_v16 }
 0x134   : > { %888 = vst.msk [vmem:[#allocation3 + $0x41] sm:$0xff] %vm878_vm14, %v847_v17 }
 0x136   : > { %v924_v18 = vpop.permute.xlu1 %923  ;;  %v922_v19 = vpop.permute.xlu0 %921 }
 0x137   : > { %963 = vst.msk [vmem:[#allocation3 + $0x48] sm:$0xff] %vm953_vm1, %v924_v18  ;;  %962 = vst.msk [vmem:[#allocation3 + $0x40] sm:$0xff] %vm953_vm1, %v922_v19 }
 0x138   : > { %1041 = vst.msk [vmem:[#allocation3 + $0x4f] sm:$0x1] %vm2412_vm5, %v1582_v2  ;;  %vm2438_vm5 = vcmask 97344  }
 0x13a   : > { %v989_v61 = vpop.permute.xlu1 %988  ;;  %v987_v62 = vpop.permute.xlu0 %986 }
 0x13b   : > { %1029 = vst.msk [vmem:[#allocation3 + $0x47] sm:$0xff] %vm2435_vm7, %v989_v61  ;;  %vm2439_vm7 = vcmask 122976   ;;  %v1061_v61 = vld [vmem:[%s2401_s3] sm:$0xff] }
 0x13c   : > { %1028 = vst.msk [vmem:[#allocation3 + $0x3f] sm:$0xfe] %vm2436_vm2, %v987_v62  ;;  %vm2440_vm2 = vcmask 130144  }
 0x13e   : > { %v433_v20 = vpop.permute.xlu1 %432  ;;  %v431_v21 = vpop.permute.xlu0 %430 }
 0x13f   : > { %470 = vst.msk [vmem:[#allocation3 + $0x58] sm:$0xff] %vm458_vm3, %v433_v20  ;;  %469 = vst.msk [vmem:[#allocation3 + $0x50] sm:$0xff] %vm458_vm3, %v431_v21 }
 0x140   : > { %547 = vst.msk [vmem:[#allocation3 + $0x5f] sm:$0x1] %vm2437_vm8, %v1582_v2  ;;  %vm2442_vm8 = vcmask 294144  }
 0x142   : > { %v498_v22 = vpop.permute.xlu1 %497  ;;  %v1054_v27 = vld [vmem:[#allocation3 + $0x48] sm:$0xff] }
 0x143   : > { %v496_v25 = vpop.permute.xlu0 %495  ;;  %v1053_v26 = vld [vmem:[#allocation3 + $0x40] sm:$0xff]  ;;  %536 = vst.msk [vmem:[#allocation3 + $0x57] sm:$0xff] %vm2438_vm5, %v498_v22  ;;  %vm2441_vm5 = vcmask 286976  }
 0x144   : > { %535 = vst.msk [vmem:[#allocation3 + $0x4f] sm:$0xfe] %vm523_vm4, %v496_v25  ;;  %v1387_v28 = vpack.c.bf16 %v1054_v27, %v1053_v26 }
 0x145   : > { %654 = vst.msk [vmem:[#allocation3 + $0x50] sm:$0x1] %vm2439_vm7, %v1582_v2  ;;  %vm2443_vm7 = vcmask 294145  }
 0x146   : > { %1389 = vmatpush3.bf16.xpose.msk.msra.mxu0 %vm2051_vm6, %v1387_v28  ;;  %v605_v29 = vpop.permute.xlu1 %604 }
 0x147   : > { %v603_v30 = vpop.permute.xlu0 %602  ;;  %1390 = vmatprep.subr.bf16.mxu0 %v1588_v14  ;;  %643 = vst.msk [vmem:[#allocation3 + $0x59] sm:$0x7f] %vm632_vm9, %v605_v29 }
 0x148   : > { %642 = vst.msk [vmem:[#allocation3 + $0x51] sm:$0xff] %vm2440_vm2, %v603_v30  ;;  %vm2444_vm2 = vcmask 90176  }
 0x14a   : > { %v680_v31 = vpop.permute.xlu1 %679 }
 0x14b   : > { %v678_v32 = vpop.permute.xlu0 %677  ;;  %717 = vst.msk [vmem:[#allocation3 + $0x58] sm:$0xff] %vm705_vm10, %v680_v31 }
 0x14c   : > { %716 = vst.msk [vmem:[#allocation3 + $0x50] sm:$0xff] %vm705_vm10, %v678_v32 }
 0x14d   : > { %794 = vst.msk [vmem:[#allocation3 + $0x5f] sm:$0x1] %vm788_vm13, %v1582_v2 }
 0x14e   : > { %v745_v33 = vpop.permute.xlu1 %744 }
 0x14f   : > { %v743_v34 = vpop.permute.xlu0 %742  ;;  %783 = vst.msk [vmem:[#allocation3 + $0x57] sm:$0xff] %vm772_vm12, %v745_v33 }
 0x150   : > { %782 = vst.msk [vmem:[#allocation3 + $0x4f] sm:$0xfe] %vm770_vm11, %v743_v34 }
 0x151   : > { %902 = vst.msk [vmem:[#allocation3 + $0x50] sm:$0x1] %vm896_vm0, %v1582_v2 }
 0x152   : > { %v853_v35 = vpop.permute.xlu1 %852 }
 0x153   : > { %v851_v36 = vpop.permute.xlu0 %850  ;;  %891 = vst.msk [vmem:[#allocation3 + $0x59] sm:$0x7f] %vm880_vm15, %v853_v35 }
 0x154   : > { %890 = vst.msk [vmem:[#allocation3 + $0x51] sm:$0xff] %vm878_vm14, %v851_v36 }
 0x156   : > { %v928_v37 = vpop.permute.xlu1 %927 }
 0x157   : > { %v926_v38 = vpop.permute.xlu0 %925  ;;  %965 = vst.msk [vmem:[#allocation3 + $0x58] sm:$0xff] %vm953_vm1, %v928_v37 }
 0x158   : > { %964 = vst.msk [vmem:[#allocation3 + $0x50] sm:$0xff] %vm953_vm1, %v926_v38 }
 0x159   : > { %1042 = vst.msk [vmem:[#allocation3 + $0x5f] sm:$0x1] %vm2441_vm5, %v1582_v2  ;;  %vm2445_vm5 = vcmask 97344  }
 0x15a   : > { %v993_v12 = vpop.permute.xlu1 %992 }
 0x15b   : > { %v991_v13 = vpop.permute.xlu0 %990  ;;  %1031 = vst.msk [vmem:[#allocation3 + $0x57] sm:$0xff] %vm2442_vm8, %v993_v12  ;;  %vm2446_vm8 = vcmask 122976  }
 0x15c   : > { %1030 = vst.msk [vmem:[#allocation3 + $0x4f] sm:$0xfe] %vm2443_vm7, %v991_v13  ;;  %vm2447_vm7 = vcmask 130144  }
 0x15e   : > { %v437_v39 = vpop.permute.xlu1 %436 }
 0x15f   : > { %v435_v40 = vpop.permute.xlu0 %434  ;;  %472 = vst.msk [vmem:[#allocation3 + $0x68] sm:$0xff] %vm458_vm3, %v437_v39 }
 0x160   : > { %471 = vst.msk [vmem:[#allocation3 + $0x60] sm:$0xff] %vm458_vm3, %v435_v40 }
 0x161   : > { %548 = vst.msk [vmem:[#allocation3 + $0x6f] sm:$0x1] %vm2444_vm2, %v1582_v2  ;;  %vm2448_vm2 = vcmask 286976  }
 0x162   : > { %v502_v41 = vpop.permute.xlu1 %501  ;;  %v1056_v0 = vld [vmem:[#allocation3 + $0x58] sm:$0xff] }
 0x163   : > { %v500_v42 = vpop.permute.xlu0 %499  ;;  %v1055_v43 = vld [vmem:[#allocation3 + $0x50] sm:$0xff]  ;;  %538 = vst.msk [vmem:[#allocation3 + $0x67] sm:$0xff] %vm2445_vm5, %v502_v41  ;;  %vm2449_vm5 = vcmask 294144  }
 0x164   : > { %537 = vst.msk [vmem:[#allocation3 + $0x5f] sm:$0xfe] %vm523_vm4, %v500_v42  ;;  %v1391_v1 = vpack.c.bf16 %v1056_v0, %v1055_v43 }
 0x165   : > { %655 = vst.msk [vmem:[#allocation3 + $0x60] sm:$0x1] %vm2446_vm8, %v1582_v2  ;;  %vm2450_vm8 = vcmask 294145  }
 0x166   : > { %1393 = vmatpush3.bf16.xpose.msk.msra.mxu0 %vm2051_vm6, %v1391_v1  ;;  %v609_v44 = vpop.permute.xlu1 %608 }
 0x167   : > { %v607_v45 = vpop.permute.xlu0 %606  ;;  %1394 = vmatprep.subr.bf16.mxu0 %v1588_v14  ;;  %645 = vst.msk [vmem:[#allocation3 + $0x69] sm:$0x7f] %vm632_vm9, %v609_v44 }
 0x168   : > { %644 = vst.msk [vmem:[#allocation3 + $0x61] sm:$0xff] %vm2447_vm7, %v607_v45  ;;  %vm2451_vm7 = vcmask 90176  }
 0x16a   : > { %v684_v46 = vpop.permute.xlu1 %683 }
 0x16b   : > { %v682_v47 = vpop.permute.xlu0 %681  ;;  %719 = vst.msk [vmem:[#allocation3 + $0x68] sm:$0xff] %vm705_vm10, %v684_v46 }
 0x16c   : > { %718 = vst.msk [vmem:[#allocation3 + $0x60] sm:$0xff] %vm705_vm10, %v682_v47 }
 0x16d   : > { %795 = vst.msk [vmem:[#allocation3 + $0x6f] sm:$0x1] %vm788_vm13, %v1582_v2 }
 0x16e   : > { %v749_v48 = vpop.permute.xlu1 %748 }
 0x16f   : > { %v747_v49 = vpop.permute.xlu0 %746  ;;  %785 = vst.msk [vmem:[#allocation3 + $0x67] sm:$0xff] %vm772_vm12, %v749_v48 }
 0x170   : > { %784 = vst.msk [vmem:[#allocation3 + $0x5f] sm:$0xfe] %vm770_vm11, %v747_v49 }
 0x171   : > { %903 = vst.msk [vmem:[#allocation3 + $0x60] sm:$0x1] %vm896_vm0, %v1582_v2 }
 0x172   : > { %v857_v50 = vpop.permute.xlu1 %856 }
 0x173   : > { %v855_v51 = vpop.permute.xlu0 %854  ;;  %893 = vst.msk [vmem:[#allocation3 + $0x69] sm:$0x7f] %vm880_vm15, %v857_v50 }
 0x174   : > { %892 = vst.msk [vmem:[#allocation3 + $0x61] sm:$0xff] %vm878_vm14, %v855_v51 }
 0x176   : > { %v932_v52 = vpop.permute.xlu1 %931 }
 0x177   : > { %v930_v53 = vpop.permute.xlu0 %929  ;;  %967 = vst.msk [vmem:[#allocation3 + $0x68] sm:$0xff] %vm953_vm1, %v932_v52 }
 0x178   : > { %966 = vst.msk [vmem:[#allocation3 + $0x60] sm:$0xff] %vm953_vm1, %v930_v53 }
 0x179   : > { %1043 = vst.msk [vmem:[#allocation3 + $0x6f] sm:$0x1] %vm2448_vm2, %v1582_v2  ;;  %vm2452_vm2 = vcmask 97344  }
 0x17a   : > { %v997_v54 = vpop.permute.xlu1 %996 }
 0x17b   : > { %v995_v55 = vpop.permute.xlu0 %994  ;;  %1033 = vst.msk [vmem:[#allocation3 + $0x67] sm:$0xff] %vm2449_vm5, %v997_v54  ;;  %vm2453_vm5 = vcmask 122976  }
 0x17c   : > { %1032 = vst.msk [vmem:[#allocation3 + $0x5f] sm:$0xfe] %vm2450_vm8, %v995_v55 }
 0x17e   : > { %v441_v23 = vpop.permute.xlu1 %440 }
 0x17f   : > { %v439_v24 = vpop.permute.xlu0 %438  ;;  %474 = vst.msk [vmem:[#allocation3 + $0x78] sm:$0xff] %vm458_vm3, %v441_v23 }
 0x180   : > { %473 = vst.msk [vmem:[#allocation3 + $0x70] sm:$0xff] %vm458_vm3, %v439_v24  ;;  %vm2454_vm3 = vcmask 130144  }
 0x181   : > { %549 = vst.msk [vmem:[#allocation3 + $0x7f] sm:$0x1] %vm2451_vm7, %v1582_v2 }
 0x182   : > { %v506_v56 = vpop.permute.xlu1 %505  ;;  %v1058_v59 = vld [vmem:[#allocation3 + $0x68] sm:$0xff] }
 0x183   : > { %v504_v57 = vpop.permute.xlu0 %503  ;;  %v1057_v58 = vld [vmem:[#allocation3 + $0x60] sm:$0xff]  ;;  %540 = vst.msk [vmem:[#allocation3 + $0x77] sm:$0xff] %vm2452_vm2, %v506_v56 }
 0x184   : > { %539 = vst.msk [vmem:[#allocation3 + $0x6f] sm:$0xfe] %vm523_vm4, %v504_v57  ;;  %v1395_v60 = vpack.c.bf16 %v1058_v59, %v1057_v58  ;;  %vm2455_vm4 = vcmask 286976  }
 0x185   : > { %656 = vst.msk [vmem:[#allocation3 + $0x70] sm:$0x1] %vm2453_vm5, %v1582_v2 }
 0x186   : > { %1397 = vmatpush3.bf16.xpose.msk.msra.mxu0 %vm2051_vm6, %v1395_v60  ;;  %v613_v63 = vpop.permute.xlu1 %612 }
 0x187   : > { %v611_v3 = vpop.permute.xlu0 %610  ;;  %1398 = vmatprep.subr.bf16.mxu0 %v1588_v14  ;;  %647 = vst.msk [vmem:[#allocation3 + $0x79] sm:$0x7f] %vm632_vm9, %v613_v63  ;;  %vm2456_vm9 = vcmask 294144  }
 0x188   : > { %646 = vst.msk [vmem:[#allocation3 + $0x71] sm:$0xff] %vm2454_vm3, %v611_v3 }
 0x18a   : > { %v688_v4 = vpop.permute.xlu1 %687 }
 0x18b   : > { %v686_v5 = vpop.permute.xlu0 %685  ;;  %721 = vst.msk [vmem:[#allocation3 + $0x78] sm:$0xff] %vm705_vm10, %v688_v4 }
 0x18c   : > { %720 = vst.msk [vmem:[#allocation3 + $0x70] sm:$0xff] %vm705_vm10, %v686_v5  ;;  %vm2457_vm10 = vmmov %vm2450_vm8 }
 0x18d   : > { %796 = vst.msk [vmem:[#allocation3 + $0x7f] sm:$0x1] %vm788_vm13, %v1582_v2 }
 0x18e   : > { %v753_v6 = vpop.permute.xlu1 %752 }
 0x18f   : > { %v751_v7 = vpop.permute.xlu0 %750  ;;  %787 = vst.msk [vmem:[#allocation3 + $0x77] sm:$0xff] %vm772_vm12, %v753_v6 }
 0x190   : > { %786 = vst.msk [vmem:[#allocation3 + $0x6f] sm:$0xfe] %vm770_vm11, %v751_v7  ;;  %vm2458_vm11 = vcmask 293888  }
 0x191   : > { %904 = vst.msk [vmem:[#allocation3 + $0x70] sm:$0x1] %vm896_vm0, %v1582_v2 }
 0x192   : > { %v861_v14 = vpop.permute.xlu1 %860 }
 0x193   : > { %v859_v9 = vpop.permute.xlu0 %858  ;;  %895 = vst.msk [vmem:[#allocation3 + $0x79] sm:$0x7f] %vm880_vm15, %v861_v14 }
 0x194   : > { %894 = vst.msk [vmem:[#allocation3 + $0x71] sm:$0xff] %vm878_vm14, %v859_v9 }
 0x196   : > { %v936_v10 = vpop.permute.xlu1 %935 }
 0x197   : > { %v934_v11 = vpop.permute.xlu0 %933  ;;  %969 = vst.msk [vmem:[#allocation3 + $0x78] sm:$0xff] %vm953_vm1, %v936_v10 }
 0x198   : > { %968 = vst.msk [vmem:[#allocation3 + $0x70] sm:$0xff] %vm953_vm1, %v934_v11 }
 0x199   : > { %1044 = vst.msk [vmem:[#allocation3 + $0x7f] sm:$0x1] %vm2455_vm4, %v1582_v2 }
 0x19a   : > { %v1001_v15 = vpop.permute.xlu1 %1000 }
 0x19b   : > { %v999_v16 = vpop.permute.xlu0 %998  ;;  %1035 = vst.msk [vmem:[#allocation3 + $0x77] sm:$0xff] %vm2456_vm9, %v1001_v15 }
 0x19c   : > { %1034 = vst.msk [vmem:[#allocation3 + $0x6f] sm:$0xfe] %vm2457_vm10, %v999_v16 }
 0x1a2   : > { %v1060_v18 = vld [vmem:[#allocation3 + $0x78] sm:$0xff] }
 0x1a3   : > { %v1059_v17 = vld [vmem:[#allocation3 + $0x70] sm:$0xff] }
 0x1a4   : > { %v1399_v19 = vpack.c.bf16 %v1060_v18, %v1059_v17 }
 0x1a6   : > { %1401 = vmatpush3.bf16.xpose.msk.msra.mxu0 %vm2051_vm6, %v1399_v19 }
 0x1ad   : > { %1368 = vmatmul.mubr.msk.f32.vlgmr.msra.gmra.mrb[0].mxu0 %vm2458_vm11, %v1061_v61 }
 0x280   : > { %v1180_v2 = vpop.f32.mrb[0].mxu0 }
 0x281   : > { %1184 = vst [vmem:[%s204_s9] sm:$0xff] %v1180_v2  ;;  %v1369_v8 = vpop.f32.mrb[1].mxu0 }
 0x282   : > { %1497 = shalt.err (!%p1494_p11)
}
 0x283   : > { %s1498_s23 = scalar_lea.hbm %s2347_s13, 128  ;;  %s1502_s8 = scalar_lea.hbm %s2402_s4, 512 }
 0x284   : > { %p1499_p12 = scmp.ne.s32.totalorder %s2347_s13, %s1498_s23  ;;  %p1503_p1 = scmp.lt.u32.totalorder %s2347_s13, %s2402_s4 }
 0x285   : > { %p1504_p2 = scmp.lt.u32.totalorder %s1502_s8, %s1498_s23  ;;  %p1506_p5 = scmp.lt.u32.totalorder %s1498_s23, %s2347_s13 }
 0x286   : > { %p1500_p13 = pnand %p1499_p12, %p1668_p3 }
 0x287   : > { %p1505_p4 = por %p1504_p2, %p1503_p1 }
 0x288   : > { %p1501_p0 = pneg %p1500_p13 }
 0x289   : > { %p1507_p6 = por %p1506_p5, %p1505_p4 }
 0x28b   : > { %p1508_p7 = pnand %p1507_p6, %p1501_p0 }
 0x28d   : > { %1511 = shalt.err (!%p1508_p7)
}
 0x28e   : > { %1402 = dma.vmem_to_hbm [thread:$0]  (%p1668_p3), %s2342_s30, 128, %s2347_s13, %s1186_s24  }
 0x28f PF: > { %p1408_p9 = scmp.ge.s32.totalorder %s1578_s22, 2  ;;  %s1213_s11 = sand.u32 1, %s1550_s15  }
 0x290   : > { %s1214_s5 = scalar_lea.sflag [#allocation5], %s1213_s11 }
 0x291   : > { %p1405_p10 = pnand %p1408_p9, %p1677_p8 }
 0x293   : > { %1545 = dma.done.wait (!%p1405_p10), %s1214_s5, 128  }
 0x294   : > { %1547 = vsyncadd (!%p1405_p10), %s1214_s5, 4294967168  ;;  %s17_s22 = sadd.s32 1, %s1578_s22   ;;  %s2459_s15 = smov %s1554_s16 }
 0x295   : > { %p14_p11 = scmp.ge.s32.totalorder %s17_s22, 6   ;;  %s2460_s16 = smov %s1558_s17 }
 0x296   : > { %s2461_s17 = smov %s1686_s7  ;;  %s2462_s18 = smov %s1570_s20 }
 0x297   : > { %s2463_s19 = smov %s1574_s21  ;;  %s2464_s20 = smov %s2467_s25 }
 0x298   : > { %s2465_s21 = smov %s2471_s26  ;;  %16 = sbr.rel (!%p14_p11) target bundleno = 5 (0x5), region = 77 }
 0x29f   :  { %1219 = vsyncpa [#allocation5], 1 }
 0x2a0   :  { %1221 = vsyncpa [#allocation5 + $0x1], 1 }

</bundles_post_ra>
